<compile_context>
chip_gen: v7x
topology: tpu7x:2x2x1
jax: 0.10.0
libtpu: 0.0.40
codegen_flags: <defaults>
</compile_context>

<pallas_src>
import functools

import jax
import jax.numpy as jnp
from jax import lax
from jax.experimental import pallas as pl
from jax.experimental.pallas import tpu as pltpu

EPS = 1e-5  # BatchNorm2d default eps


def _cgblock_kernel(x_ref, w1_ref, wloc_ref, wsur_ref, aff_ref, mask_ref,
                    wg1_ref, bg1_ref, wg2_ref, bg2_ref, out_ref,
                    *, H, W, dilation, use_skip, res_type):
    Nb, Cin, HW = x_ref.shape
    Chalf = w1_ref.shape[0]
    C = 2 * Chalf

    w1 = w1_ref[...]                                   # (Chalf, Cin)
    wloc = wloc_ref[...]                               # (Chalf, 9)
    wsur = wsur_ref[...]                               # (Chalf, 9)
    wg1, bg1 = wg1_ref[...], bg1_ref[...]              # (C/8, C), (C/8, 1)
    wg2, bg2 = wg2_ref[...], bg2_ref[...]              # (C, C/8), (C, 1)

    # Folded BN scale/shift + PReLU alpha, per output half (sublane-aligned slices).
    s_loc, b_loc, a_loc = (aff_ref[0:Chalf, 0:1], aff_ref[0:Chalf, 1:2],
                           aff_ref[0:Chalf, 2:3])
    s_sur, b_sur, a_sur = (aff_ref[Chalf:C, 0:1], aff_ref[Chalf:C, 1:2],
                           aff_ref[Chalf:C, 2:3])

    for b in range(Nb):                                # static unroll over images in block
        x = x_ref[b]                                   # (Cin, HW) f32, lane-dense

        # ---- 1x1 pointwise conv: lane-dense MXU matmul ----
        xh = jnp.dot(w1, x, preferred_element_type=jnp.float32)   # (Chalf, HW)

        # ---- depthwise 3x3 taps as lane rolls (XLU) + boundary masks (VPU) ----
        loc = xh * wloc[:, 4:5]                        # center tap: no roll, no mask
        sur = xh * wsur[:, 4:5]
        for t, d in ((0, 1), (1, dilation)):           # t=0 -> loc, t=1 -> sur
            for k in range(9):
                if k == 4:
                    continue
                di = (k // 3 - 1) * d
                dj = (k % 3 - 1) * d
                shift = (-(di * W + dj)) % HW          # static positive lane roll
                rolled = pltpu.roll(xh, shift, 1)      # (Chalf, HW)
                m = mask_ref[9 * t + k:9 * t + k + 1, :]        # (1, HW) validity mask
                w_col = (wloc if t == 0 else wsur)[:, k:k + 1]  # (Chalf, 1)
                contrib = rolled * (m * w_col)
                if t == 0:
                    loc = loc + contrib
                else:
                    sur = sur + contrib

        # ---- joi: folded BatchNorm (inference) + PReLU, per half (no lane concat) ----
        loc_bn = loc * s_loc + b_loc
        sur_bn = sur * s_sur + b_sur
        loc_a = jnp.where(loc_bn > 0, loc_bn, a_loc * loc_bn)
        sur_a = jnp.where(sur_bn > 0, sur_bn, a_sur * sur_bn)

        if use_skip and res_type == 'LRL':
            loc_a = loc_a + x[0:Chalf, :]
            sur_a = sur_a + x[Chalf:C, :]

        # ---- global average pool + bottleneck MLP + sigmoid channel gate ----
        pooled = jnp.concatenate(
            [jnp.mean(loc_a, axis=1, keepdims=True),
             jnp.mean(sur_a, axis=1, keepdims=True)], axis=0)       # (C, 1)
        h1 = jnp.dot(wg1, pooled, preferred_element_type=jnp.float32) + bg1
        gate = jax.nn.sigmoid(
            jnp.dot(wg2, h1, preferred_element_type=jnp.float32) + bg2)  # (C, 1)

        y_loc = loc_a * gate[0:Chalf, :]
        y_sur = sur_a * gate[Chalf:C, :]
        if use_skip and res_type == 'GRL':
            y_loc = y_loc + x[0:Chalf, :]
            y_sur = y_sur + x[Chalf:C, :]

        # Two full (Chalf, HW) sublane slabs -> unmasked lane-dense stores.
        out_ref[b, 0:Chalf, :] = y_loc
        out_ref[b, Chalf:C, :] = y_sur


def cgblock_pallas(x, params, *, dilation, use_skip, res_type):
    """x: (N, Cin, H, W) NCHW (PyTorch-native). Returns (N, Cout, H, W)."""
    N, Cin, H, W = x.shape
    HW = H * W
    w1 = params['w1']
    Chalf = w1.shape[0]
    C = 2 * Chalf
    C8 = C // 8

    # Fold BN (inference) into per-channel scale/shift; stack with PReLU alpha.
    scale = params['gamma'] * lax.rsqrt(params['var'] + EPS)
    shift = params['beta'] - params['mean'] * scale
    aff = jnp.stack([scale, shift, jnp.broadcast_to(params['alpha'], (C,))],
                    axis=1).astype(jnp.float32)                       # (C, 3)

    # Per-tap boundary masks: rows 0..8 -> loc (d=1), rows 9..17 -> sur (d=dilation).
    ii, jj = jnp.meshgrid(jnp.arange(H), jnp.arange(W), indexing='ij')
    rows = []
    for d in (1, dilation):
        for k in range(9):
            di = (k // 3 - 1) * d
            dj = (k % 3 - 1) * d
            ok = ((ii + di >= 0) & (ii + di < H) & (jj + dj >= 0) & (jj + dj < W))
            rows.append(ok.reshape(-1))
    masks = jnp.stack(rows).astype(jnp.float32)                       # (18, HW)

    bg1 = params['bg1'].reshape(C8, 1).astype(jnp.float32)
    bg2 = params['bg2'].reshape(C, 1).astype(jnp.float32)

    # Images per grid step: keep >= 2 parallel steps when possible (v7x has 2 TCs),
    # amortize the ~0.35us/step overhead for larger batches.
    nb = N // 2 if (N >= 4 and N % 2 == 0) else 1

    kernel = functools.partial(_cgblock_kernel, H=H, W=W, dilation=dilation,
                               use_skip=use_skip, res_type=res_type)

    grid_spec = pltpu.PrefetchScalarGridSpec(
        num_scalar_prefetch=0,
        grid=(N // nb,),
        in_specs=[
            pl.BlockSpec((nb, Cin, HW), lambda n: (n, 0, 0)),   # x, channel-major lane-dense
            pl.BlockSpec((Chalf, Cin), lambda n: (0, 0)),       # w1
            pl.BlockSpec((Chalf, 9), lambda n: (0, 0)),         # wloc
            pl.BlockSpec((Chalf, 9), lambda n: (0, 0)),         # wsur
            pl.BlockSpec((C, 3), lambda n: (0, 0)),             # folded BN + alpha
            pl.BlockSpec((18, HW), lambda n: (0, 0)),           # tap boundary masks
            pl.BlockSpec((C8, C), lambda n: (0, 0)),            # wg1
            pl.BlockSpec((C8, 1), lambda n: (0, 0)),            # bg1
            pl.BlockSpec((C, C8), lambda n: (0, 0)),            # wg2
            pl.BlockSpec((C, 1), lambda n: (0, 0)),             # bg2
        ],
        out_specs=pl.BlockSpec((nb, C, HW), lambda n: (n, 0, 0)),
    )

    out = pl.pallas_call(
        kernel,
        out_shape=jax.ShapeDtypeStruct((N, C, HW), jnp.float32),
        grid_spec=grid_spec,
        compiler_params=pltpu.CompilerParams(dimension_semantics=("parallel",)),
    )(x.reshape(N, Cin, HW).astype(jnp.float32),
      w1.astype(jnp.float32),
      params['wloc'].astype(jnp.float32),
      params['wsur'].astype(jnp.float32),
      aff, masks,
      params['wg1'].astype(jnp.float32), bg1,
      params['wg2'].astype(jnp.float32), bg2)

    return out.reshape(N, C, H, W)


def cgblock_ref(x, params, *, dilation, use_skip, res_type):
    """Pure-JAX NCHW reference matching the PyTorch forward semantics."""
    N, Cin, H, W = x.shape
    Chalf = params['w1'].shape[0]
    C = 2 * Chalf
    d = dilation
    xh = jnp.einsum('nchw,dc->ndhw', x, params['w1'],
                    precision=lax.Precision.HIGHEST)
    dn = lax.conv_dimension_numbers(xh.shape, (Chalf, 1, 3, 3),
                                    ('NCHW', 'OIHW', 'NCHW'))
    kloc = params['wloc'].reshape(Chalf, 1, 3, 3)
    ksur = params['wsur'].reshape(Chalf, 1, 3, 3)
    loc = lax.conv_general_dilated(xh, kloc, (1, 1), ((1, 1), (1, 1)),
                                   dimension_numbers=dn, feature_group_count=Chalf,
                                   precision=lax.Precision.HIGHEST)
    sur = lax.conv_general_dilated(xh, ksur, (1, 1), ((d, d), (d, d)),
                                   rhs_dilation=(d, d),
                                   dimension_numbers=dn, feature_group_count=Chalf,
                                   precision=lax.Precision.HIGHEST)
    xcat = jnp.concatenate([loc, sur], axis=1)
    mean = params['mean'].reshape(1, C, 1, 1)
    var = params['var'].reshape(1, C, 1, 1)
    gamma = params['gamma'].reshape(1, C, 1, 1)
    beta = params['beta'].reshape(1, C, 1, 1)
    xbn = (xcat - mean) * lax.rsqrt(var + EPS) * gamma + beta
    xact = jnp.where(xbn > 0, xbn, params['alpha'] * xbn)
    if use_skip and res_type == 'LRL':
        xact = xact + x
    pooled = jnp.mean(xact, axis=(2, 3))                              # (N, C)
    h1 = pooled @ params['wg1'].T + params['bg1']
    gate = jax.nn.sigmoid(h1 @ params['wg2'].T + params['bg2'])
    y = xact * gate[:, :, None, None]
    if use_skip and res_type == 'GRL':
        y = y + x
    return y


if __name__ == "__main__":
    # Small deterministic config: in_channels = out_channels = 16, stride=1,
    # dilation=2, res_type='GRL' -> use_skip=True, GRL residual applied.
    N, H, W = 2, 16, 16
    Cin = Cout = 16
    stride, dilation, res_type = 1, 2, 'GRL'
    use_skip = (stride == 1 and Cin == Cout)
    Chalf, C8 = Cout // 2, Cout // 8

    key = jax.random.PRNGKey(0)
    ks = jax.random.split(key, 12)
    params = dict(
        w1=0.3 * jax.random.normal(ks[0], (Chalf, Cin), jnp.float32),
        wloc=0.3 * jax.random.normal(ks[1], (Chalf, 9), jnp.float32),
        wsur=0.3 * jax.random.normal(ks[2], (Chalf, 9), jnp.float32),
        gamma=1.0 + 0.1 * jax.random.normal(ks[3], (Cout,), jnp.float32),
        beta=0.1 * jax.random.normal(ks[4], (Cout,), jnp.float32),
        mean=0.1 * jax.random.normal(ks[5], (Cout,), jnp.float32),
        var=jax.random.uniform(ks[6], (Cout,), jnp.float32, minval=0.5, maxval=1.5),
        alpha=jnp.float32(0.25),  # nn.PReLU() default init
        wg1=0.3 * jax.random.normal(ks[7], (C8, Cout), jnp.float32),
        bg1=0.1 * jax.random.normal(ks[8], (C8,), jnp.float32),
        wg2=0.3 * jax.random.normal(ks[9], (Cout, C8), jnp.float32),
        bg2=0.1 * jax.random.normal(ks[10], (Cout,), jnp.float32),
    )
    x = jax.random.normal(ks[11], (N, Cin, H, W), jnp.float32)

    out = cgblock_pallas(x, params, dilation=dilation,
                         use_skip=use_skip, res_type=res_type)
    out = jax.block_until_ready(out)

    ref = cgblock_ref(x, params, dilation=dilation,
                      use_skip=use_skip, res_type=res_type)
    assert out.shape == (N, Cout, H, W), out.shape
    assert bool(jnp.all(jnp.isfinite(out)))
    max_err = float(jnp.max(jnp.abs(out - ref)))
    assert bool(jnp.allclose(out, ref, rtol=1e-2, atol=1e-2)), max_err
    print("KERNEL_OK")
</pallas_src>

<mosaic_0001>
module attributes {stable_mosaic.version = 11 : i64} {
  func.func @_cgblock_kernel(%arg0: i32, %arg1: memref<1x16x256xf32, #tpu.memory_space<vmem>>, %arg2: memref<8x16xf32, #tpu.memory_space<vmem>>, %arg3: memref<8x9xf32, #tpu.memory_space<vmem>>, %arg4: memref<8x9xf32, #tpu.memory_space<vmem>>, %arg5: memref<16x3xf32, #tpu.memory_space<vmem>>, %arg6: memref<18x256xf32, #tpu.memory_space<vmem>>, %arg7: memref<2x16xf32, #tpu.memory_space<vmem>>, %arg8: memref<2x1xf32, #tpu.memory_space<vmem>>, %arg9: memref<16x2xf32, #tpu.memory_space<vmem>>, %arg10: memref<16x1xf32, #tpu.memory_space<vmem>>, %arg11: memref<1x16x256xf32, #tpu.memory_space<vmem>>) attributes {dimension_semantics = [#tpu.dimension_semantics<parallel>], iteration_bounds = array<i64: 2>, scalar_prefetch = 0 : i64, scratch_operands = 0 : i64, tpu.core_type = #tpu.core_type<tc>, window_params = [{transform_indices = @transform_0, window_bounds = array<i64: 1, 16, 256>}, {pipeline_mode = #tpu.pipeline_mode<synchronous>, transform_indices = @transform_1, window_bounds = array<i64: 8, 16>}, {pipeline_mode = #tpu.pipeline_mode<synchronous>, transform_indices = @transform_2, window_bounds = array<i64: 8, 9>}, {pipeline_mode = #tpu.pipeline_mode<synchronous>, transform_indices = @transform_3, window_bounds = array<i64: 8, 9>}, {pipeline_mode = #tpu.pipeline_mode<synchronous>, transform_indices = @transform_4, window_bounds = array<i64: 16, 3>}, {pipeline_mode = #tpu.pipeline_mode<synchronous>, transform_indices = @transform_5, window_bounds = array<i64: 18, 256>}, {pipeline_mode = #tpu.pipeline_mode<synchronous>, transform_indices = @transform_6, window_bounds = array<i64: 2, 16>}, {pipeline_mode = #tpu.pipeline_mode<synchronous>, transform_indices = @transform_7, window_bounds = array<i64: 2, 1>}, {pipeline_mode = #tpu.pipeline_mode<synchronous>, transform_indices = @transform_8, window_bounds = array<i64: 16, 2>}, {pipeline_mode = #tpu.pipeline_mode<synchronous>, transform_indices = @transform_9, window_bounds = array<i64: 16, 1>}, {transform_indices = @transform_10, window_bounds = array<i64: 1, 16, 256>}]} {
    %c0 = arith.constant 0 : index
    %c0_0 = arith.constant 0 : index
    %0 = vector.load %arg2[%c0, %c0_0] : memref<8x16xf32, #tpu.memory_space<vmem>>, vector<8x16xf32>
    %c0_1 = arith.constant 0 : index
    %c0_2 = arith.constant 0 : index
    %1 = vector.load %arg3[%c0_1, %c0_2] : memref<8x9xf32, #tpu.memory_space<vmem>>, vector<8x9xf32>
    %c0_3 = arith.constant 0 : index
    %c0_4 = arith.constant 0 : index
    %2 = vector.load %arg4[%c0_3, %c0_4] : memref<8x9xf32, #tpu.memory_space<vmem>>, vector<8x9xf32>
    %c0_5 = arith.constant 0 : index
    %c0_6 = arith.constant 0 : index
    %3 = vector.load %arg7[%c0_5, %c0_6] : memref<2x16xf32, #tpu.memory_space<vmem>>, vector<2x16xf32>
    %c0_7 = arith.constant 0 : index
    %c0_8 = arith.constant 0 : index
    %4 = vector.load %arg8[%c0_7, %c0_8] : memref<2x1xf32, #tpu.memory_space<vmem>>, vector<2x1xf32>
    %c0_9 = arith.constant 0 : index
    %c0_10 = arith.constant 0 : index
    %5 = vector.load %arg9[%c0_9, %c0_10] : memref<16x2xf32, #tpu.memory_space<vmem>>, vector<16x2xf32>
    %c0_11 = arith.constant 0 : index
    %c0_12 = arith.constant 0 : index
    %6 = vector.load %arg10[%c0_11, %c0_12] : memref<16x1xf32, #tpu.memory_space<vmem>>, vector<16x1xf32>
    %c0_13 = arith.constant 0 : index
    %c0_14 = arith.constant 0 : index
    %7 = vector.load %arg5[%c0_13, %c0_14] : memref<16x3xf32, #tpu.memory_space<vmem>>, vector<8x1xf32>
    %c0_15 = arith.constant 0 : index
    %c1 = arith.constant 1 : index
    %8 = vector.load %arg5[%c0_15, %c1] : memref<16x3xf32, #tpu.memory_space<vmem>>, vector<8x1xf32>
    %c0_16 = arith.constant 0 : index
    %c2 = arith.constant 2 : index
    %9 = vector.load %arg5[%c0_16, %c2] : memref<16x3xf32, #tpu.memory_space<vmem>>, vector<8x1xf32>
    %c8 = arith.constant 8 : index
    %c0_17 = arith.constant 0 : index
    %10 = vector.load %arg5[%c8, %c0_17] : memref<16x3xf32, #tpu.memory_space<vmem>>, vector<8x1xf32>
    %c8_18 = arith.constant 8 : index
    %c1_19 = arith.constant 1 : index
    %11 = vector.load %arg5[%c8_18, %c1_19] : memref<16x3xf32, #tpu.memory_space<vmem>>, vector<8x1xf32>
    %c8_20 = arith.constant 8 : index
    %c2_21 = arith.constant 2 : index
    %12 = vector.load %arg5[%c8_20, %c2_21] : memref<16x3xf32, #tpu.memory_space<vmem>>, vector<8x1xf32>
    %c0_22 = arith.constant 0 : index
    %c0_23 = arith.constant 0 : index
    %c0_24 = arith.constant 0 : index
    %13 = vector.load %arg1[%c0_22, %c0_23, %c0_24] : memref<1x16x256xf32, #tpu.memory_space<vmem>>, vector<1x16x256xf32>
    %14 = vector.shape_cast %13 : vector<1x16x256xf32> to vector<16x256xf32>
    %cst = arith.constant dense<0.000000e+00> : vector<8x256xf32>
    %15 = tpu.matmul %0, %14, %cst {dimension_numbers = #tpu.dot_dimension_numbers<[1], [0], [0], [1], [0, 0, 1, 1], [], []>} : vector<8x16xf32>, vector<16x256xf32>, vector<8x256xf32> -> vector<8x256xf32>
    %16 = vector.extract_strided_slice %1 {offsets = [0, 4], sizes = [8, 1], strides = [1, 1]} : vector<8x9xf32> to vector<8x1xf32>
    %17 = vector.broadcast %16 : vector<8x1xf32> to vector<8x256xf32>
    %18 = arith.mulf %15, %17 : vector<8x256xf32>
    %19 = vector.extract_strided_slice %2 {offsets = [0, 4], sizes = [8, 1], strides = [1, 1]} : vector<8x9xf32> to vector<8x1xf32>
    %20 = vector.broadcast %19 : vector<8x1xf32> to vector<8x256xf32>
    %21 = arith.mulf %15, %20 : vector<8x256xf32>
    %c17_i32 = arith.constant 17 : i32
    %22 = tpu.dynamic_rotate %15 by %c17_i32 dim 1 : vector<8x256xf32>, i32 -> vector<8x256xf32>
    %c0_25 = arith.constant 0 : index
    %c0_26 = arith.constant 0 : index
    %23 = vector.load %arg6[%c0_25, %c0_26] : memref<18x256xf32, #tpu.memory_space<vmem>>, vector<1x256xf32>
    %24 = vector.extract_strided_slice %1 {offsets = [0, 0], sizes = [8, 1], strides = [1, 1]} : vector<8x9xf32> to vector<8x1xf32>
    %25 = vector.broadcast %23 : vector<1x256xf32> to vector<8x256xf32>
    %26 = vector.broadcast %24 : vector<8x1xf32> to vector<8x256xf32>
    %27 = arith.mulf %25, %26 : vector<8x256xf32>
    %28 = arith.mulf %22, %27 : vector<8x256xf32>
    %29 = arith.addf %18, %28 : vector<8x256xf32>
    %c16_i32 = arith.constant 16 : i32
    %30 = tpu.dynamic_rotate %15 by %c16_i32 dim 1 : vector<8x256xf32>, i32 -> vector<8x256xf32>
    %c1_27 = arith.constant 1 : index
    %c0_28 = arith.constant 0 : index
    %31 = vector.load %arg6[%c1_27, %c0_28] : memref<18x256xf32, #tpu.memory_space<vmem>>, vector<1x256xf32>
    %32 = vector.extract_strided_slice %1 {offsets = [0, 1], sizes = [8, 1], strides = [1, 1]} : vector<8x9xf32> to vector<8x1xf32>
    %33 = vector.broadcast %31 : vector<1x256xf32> to vector<8x256xf32>
    %34 = vector.broadcast %32 : vector<8x1xf32> to vector<8x256xf32>
    %35 = arith.mulf %33, %34 : vector<8x256xf32>
    %36 = arith.mulf %30, %35 : vector<8x256xf32>
    %37 = arith.addf %29, %36 : vector<8x256xf32>
    %c15_i32 = arith.constant 15 : i32
    %38 = tpu.dynamic_rotate %15 by %c15_i32 dim 1 : vector<8x256xf32>, i32 -> vector<8x256xf32>
    %c2_29 = arith.constant 2 : index
    %c0_30 = arith.constant 0 : index
    %39 = vector.load %arg6[%c2_29, %c0_30] : memref<18x256xf32, #tpu.memory_space<vmem>>, vector<1x256xf32>
    %40 = vector.extract_strided_slice %1 {offsets = [0, 2], sizes = [8, 1], strides = [1, 1]} : vector<8x9xf32> to vector<8x1xf32>
    %41 = vector.broadcast %39 : vector<1x256xf32> to vector<8x256xf32>
    %42 = vector.broadcast %40 : vector<8x1xf32> to vector<8x256xf32>
    %43 = arith.mulf %41, %42 : vector<8x256xf32>
    %44 = arith.mulf %38, %43 : vector<8x256xf32>
    %45 = arith.addf %37, %44 : vector<8x256xf32>
    %c1_i32 = arith.constant 1 : i32
    %46 = tpu.dynamic_rotate %15 by %c1_i32 dim 1 : vector<8x256xf32>, i32 -> vector<8x256xf32>
    %c3 = arith.constant 3 : index
    %c0_31 = arith.constant 0 : index
    %47 = vector.load %arg6[%c3, %c0_31] : memref<18x256xf32, #tpu.memory_space<vmem>>, vector<1x256xf32>
    %48 = vector.extract_strided_slice %1 {offsets = [0, 3], sizes = [8, 1], strides = [1, 1]} : vector<8x9xf32> to vector<8x1xf32>
    %49 = vector.broadcast %47 : vector<1x256xf32> to vector<8x256xf32>
    %50 = vector.broadcast %48 : vector<8x1xf32> to vector<8x256xf32>
    %51 = arith.mulf %49, %50 : vector<8x256xf32>
    %52 = arith.mulf %46, %51 : vector<8x256xf32>
    %53 = arith.addf %45, %52 : vector<8x256xf32>
    %c255_i32 = arith.constant 255 : i32
    %54 = tpu.dynamic_rotate %15 by %c255_i32 dim 1 : vector<8x256xf32>, i32 -> vector<8x256xf32>
    %c5 = arith.constant 5 : index
    %c0_32 = arith.constant 0 : index
    %55 = vector.load %arg6[%c5, %c0_32] : memref<18x256xf32, #tpu.memory_space<vmem>>, vector<1x256xf32>
    %56 = vector.extract_strided_slice %1 {offsets = [0, 5], sizes = [8, 1], strides = [1, 1]} : vector<8x9xf32> to vector<8x1xf32>
    %57 = vector.broadcast %55 : vector<1x256xf32> to vector<8x256xf32>
    %58 = vector.broadcast %56 : vector<8x1xf32> to vector<8x256xf32>
    %59 = arith.mulf %57, %58 : vector<8x256xf32>
    %60 = arith.mulf %54, %59 : vector<8x256xf32>
    %61 = arith.addf %53, %60 : vector<8x256xf32>
    %c241_i32 = arith.constant 241 : i32
    %62 = tpu.dynamic_rotate %15 by %c241_i32 dim 1 : vector<8x256xf32>, i32 -> vector<8x256xf32>
    %c6 = arith.constant 6 : index
    %c0_33 = arith.constant 0 : index
    %63 = vector.load %arg6[%c6, %c0_33] : memref<18x256xf32, #tpu.memory_space<vmem>>, vector<1x256xf32>
    %64 = vector.extract_strided_slice %1 {offsets = [0, 6], sizes = [8, 1], strides = [1, 1]} : vector<8x9xf32> to vector<8x1xf32>
    %65 = vector.broadcast %63 : vector<1x256xf32> to vector<8x256xf32>
    %66 = vector.broadcast %64 : vector<8x1xf32> to vector<8x256xf32>
    %67 = arith.mulf %65, %66 : vector<8x256xf32>
    %68 = arith.mulf %62, %67 : vector<8x256xf32>
    %69 = arith.addf %61, %68 : vector<8x256xf32>
    %c240_i32 = arith.constant 240 : i32
    %70 = tpu.dynamic_rotate %15 by %c240_i32 dim 1 : vector<8x256xf32>, i32 -> vector<8x256xf32>
    %c7 = arith.constant 7 : index
    %c0_34 = arith.constant 0 : index
    %71 = vector.load %arg6[%c7, %c0_34] : memref<18x256xf32, #tpu.memory_space<vmem>>, vector<1x256xf32>
    %72 = vector.extract_strided_slice %1 {offsets = [0, 7], sizes = [8, 1], strides = [1, 1]} : vector<8x9xf32> to vector<8x1xf32>
    %73 = vector.broadcast %71 : vector<1x256xf32> to vector<8x256xf32>
    %74 = vector.broadcast %72 : vector<8x1xf32> to vector<8x256xf32>
    %75 = arith.mulf %73, %74 : vector<8x256xf32>
    %76 = arith.mulf %70, %75 : vector<8x256xf32>
    %77 = arith.addf %69, %76 : vector<8x256xf32>
    %c239_i32 = arith.constant 239 : i32
    %78 = tpu.dynamic_rotate %15 by %c239_i32 dim 1 : vector<8x256xf32>, i32 -> vector<8x256xf32>
    %c8_35 = arith.constant 8 : index
    %c0_36 = arith.constant 0 : index
    %79 = vector.load %arg6[%c8_35, %c0_36] : memref<18x256xf32, #tpu.memory_space<vmem>>, vector<1x256xf32>
    %80 = vector.extract_strided_slice %1 {offsets = [0, 8], sizes = [8, 1], strides = [1, 1]} : vector<8x9xf32> to vector<8x1xf32>
    %81 = vector.broadcast %79 : vector<1x256xf32> to vector<8x256xf32>
    %82 = vector.broadcast %80 : vector<8x1xf32> to vector<8x256xf32>
    %83 = arith.mulf %81, %82 : vector<8x256xf32>
    %84 = arith.mulf %78, %83 : vector<8x256xf32>
    %85 = arith.addf %77, %84 : vector<8x256xf32>
    %c34_i32 = arith.constant 34 : i32
    %86 = tpu.dynamic_rotate %15 by %c34_i32 dim 1 : vector<8x256xf32>, i32 -> vector<8x256xf32>
    %c9 = arith.constant 9 : index
    %c0_37 = arith.constant 0 : index
    %87 = vector.load %arg6[%c9, %c0_37] : memref<18x256xf32, #tpu.memory_space<vmem>>, vector<1x256xf32>
    %88 = vector.extract_strided_slice %2 {offsets = [0, 0], sizes = [8, 1], strides = [1, 1]} : vector<8x9xf32> to vector<8x1xf32>
    %89 = vector.broadcast %87 : vector<1x256xf32> to vector<8x256xf32>
    %90 = vector.broadcast %88 : vector<8x1xf32> to vector<8x256xf32>
    %91 = arith.mulf %89, %90 : vector<8x256xf32>
    %92 = arith.mulf %86, %91 : vector<8x256xf32>
    %93 = arith.addf %21, %92 : vector<8x256xf32>
    %c32_i32 = arith.constant 32 : i32
    %94 = tpu.dynamic_rotate %15 by %c32_i32 dim 1 : vector<8x256xf32>, i32 -> vector<8x256xf32>
    %c10 = arith.constant 10 : index
    %c0_38 = arith.constant 0 : index
    %95 = vector.load %arg6[%c10, %c0_38] : memref<18x256xf32, #tpu.memory_space<vmem>>, vector<1x256xf32>
    %96 = vector.extract_strided_slice %2 {offsets = [0, 1], sizes = [8, 1], strides = [1, 1]} : vector<8x9xf32> to vector<8x1xf32>
    %97 = vector.broadcast %95 : vector<1x256xf32> to vector<8x256xf32>
    %98 = vector.broadcast %96 : vector<8x1xf32> to vector<8x256xf32>
    %99 = arith.mulf %97, %98 : vector<8x256xf32>
    %100 = arith.mulf %94, %99 : vector<8x256xf32>
    %101 = arith.addf %93, %100 : vector<8x256xf32>
    %c30_i32 = arith.constant 30 : i32
    %102 = tpu.dynamic_rotate %15 by %c30_i32 dim 1 : vector<8x256xf32>, i32 -> vector<8x256xf32>
    %c11 = arith.constant 11 : index
    %c0_39 = arith.constant 0 : index
    %103 = vector.load %arg6[%c11, %c0_39] : memref<18x256xf32, #tpu.memory_space<vmem>>, vector<1x256xf32>
    %104 = vector.extract_strided_slice %2 {offsets = [0, 2], sizes = [8, 1], strides = [1, 1]} : vector<8x9xf32> to vector<8x1xf32>
    %105 = vector.broadcast %103 : vector<1x256xf32> to vector<8x256xf32>
    %106 = vector.broadcast %104 : vector<8x1xf32> to vector<8x256xf32>
    %107 = arith.mulf %105, %106 : vector<8x256xf32>
    %108 = arith.mulf %102, %107 : vector<8x256xf32>
    %109 = arith.addf %101, %108 : vector<8x256xf32>
    %c2_i32 = arith.constant 2 : i32
    %110 = tpu.dynamic_rotate %15 by %c2_i32 dim 1 : vector<8x256xf32>, i32 -> vector<8x256xf32>
    %c12 = arith.constant 12 : index
    %c0_40 = arith.constant 0 : index
    %111 = vector.load %arg6[%c12, %c0_40] : memref<18x256xf32, #tpu.memory_space<vmem>>, vector<1x256xf32>
    %112 = vector.extract_strided_slice %2 {offsets = [0, 3], sizes = [8, 1], strides = [1, 1]} : vector<8x9xf32> to vector<8x1xf32>
    %113 = vector.broadcast %111 : vector<1x256xf32> to vector<8x256xf32>
    %114 = vector.broadcast %112 : vector<8x1xf32> to vector<8x256xf32>
    %115 = arith.mulf %113, %114 : vector<8x256xf32>
    %116 = arith.mulf %110, %115 : vector<8x256xf32>
    %117 = arith.addf %109, %116 : vector<8x256xf32>
    %c254_i32 = arith.constant 254 : i32
    %118 = tpu.dynamic_rotate %15 by %c254_i32 dim 1 : vector<8x256xf32>, i32 -> vector<8x256xf32>
    %c14 = arith.constant 14 : index
    %c0_41 = arith.constant 0 : index
    %119 = vector.load %arg6[%c14, %c0_41] : memref<18x256xf32, #tpu.memory_space<vmem>>, vector<1x256xf32>
    %120 = vector.extract_strided_slice %2 {offsets = [0, 5], sizes = [8, 1], strides = [1, 1]} : vector<8x9xf32> to vector<8x1xf32>
    %121 = vector.broadcast %119 : vector<1x256xf32> to vector<8x256xf32>
    %122 = vector.broadcast %120 : vector<8x1xf32> to vector<8x256xf32>
    %123 = arith.mulf %121, %122 : vector<8x256xf32>
    %124 = arith.mulf %118, %123 : vector<8x256xf32>
    %125 = arith.addf %117, %124 : vector<8x256xf32>
    %c226_i32 = arith.constant 226 : i32
    %126 = tpu.dynamic_rotate %15 by %c226_i32 dim 1 : vector<8x256xf32>, i32 -> vector<8x256xf32>
    %c15 = arith.constant 15 : index
    %c0_42 = arith.constant 0 : index
    %127 = vector.load %arg6[%c15, %c0_42] : memref<18x256xf32, #tpu.memory_space<vmem>>, vector<1x256xf32>
    %128 = vector.extract_strided_slice %2 {offsets = [0, 6], sizes = [8, 1], strides = [1, 1]} : vector<8x9xf32> to vector<8x1xf32>
    %129 = vector.broadcast %127 : vector<1x256xf32> to vector<8x256xf32>
    %130 = vector.broadcast %128 : vector<8x1xf32> to vector<8x256xf32>
    %131 = arith.mulf %129, %130 : vector<8x256xf32>
    %132 = arith.mulf %126, %131 : vector<8x256xf32>
    %133 = arith.addf %125, %132 : vector<8x256xf32>
    %c224_i32 = arith.constant 224 : i32
    %134 = tpu.dynamic_rotate %15 by %c224_i32 dim 1 : vector<8x256xf32>, i32 -> vector<8x256xf32>
    %c16 = arith.constant 16 : index
    %c0_43 = arith.constant 0 : index
    %135 = vector.load %arg6[%c16, %c0_43] : memref<18x256xf32, #tpu.memory_space<vmem>>, vector<1x256xf32>
    %136 = vector.extract_strided_slice %2 {offsets = [0, 7], sizes = [8, 1], strides = [1, 1]} : vector<8x9xf32> to vector<8x1xf32>
    %137 = vector.broadcast %135 : vector<1x256xf32> to vector<8x256xf32>
    %138 = vector.broadcast %136 : vector<8x1xf32> to vector<8x256xf32>
    %139 = arith.mulf %137, %138 : vector<8x256xf32>
    %140 = arith.mulf %134, %139 : vector<8x256xf32>
    %141 = arith.addf %133, %140 : vector<8x256xf32>
    %c222_i32 = arith.constant 222 : i32
    %142 = tpu.dynamic_rotate %15 by %c222_i32 dim 1 : vector<8x256xf32>, i32 -> vector<8x256xf32>
    %c17 = arith.constant 17 : index
    %c0_44 = arith.constant 0 : index
    %143 = vector.load %arg6[%c17, %c0_44] : memref<18x256xf32, #tpu.memory_space<vmem>>, vector<1x256xf32>
    %144 = vector.extract_strided_slice %2 {offsets = [0, 8], sizes = [8, 1], strides = [1, 1]} : vector<8x9xf32> to vector<8x1xf32>
    %145 = vector.broadcast %143 : vector<1x256xf32> to vector<8x256xf32>
    %146 = vector.broadcast %144 : vector<8x1xf32> to vector<8x256xf32>
    %147 = arith.mulf %145, %146 : vector<8x256xf32>
    %148 = arith.mulf %142, %147 : vector<8x256xf32>
    %149 = arith.addf %141, %148 : vector<8x256xf32>
    %150 = vector.broadcast %7 : vector<8x1xf32> to vector<8x256xf32>
    %151 = arith.mulf %85, %150 : vector<8x256xf32>
    %152 = vector.broadcast %8 : vector<8x1xf32> to vector<8x256xf32>
    %153 = arith.addf %151, %152 : vector<8x256xf32>
    %154 = vector.broadcast %10 : vector<8x1xf32> to vector<8x256xf32>
    %155 = arith.mulf %149, %154 : vector<8x256xf32>
    %156 = vector.broadcast %11 : vector<8x1xf32> to vector<8x256xf32>
    %157 = arith.addf %155, %156 : vector<8x256xf32>
    %cst_45 = arith.constant 0.000000e+00 : f32
    %158 = vector.broadcast %cst_45 : f32 to vector<8x256xf32>
    %159 = arith.cmpf ogt, %153, %158 : vector<8x256xf32>
    %160 = vector.broadcast %9 : vector<8x1xf32> to vector<8x256xf32>
    %161 = arith.mulf %160, %153 : vector<8x256xf32>
    %162 = arith.select %159, %153, %161 : vector<8x256xi1>, vector<8x256xf32>
    %cst_46 = arith.constant 0.000000e+00 : f32
    %163 = vector.broadcast %cst_46 : f32 to vector<8x256xf32>
    %164 = arith.cmpf ogt, %157, %163 : vector<8x256xf32>
    %165 = vector.broadcast %12 : vector<8x1xf32> to vector<8x256xf32>
    %166 = arith.mulf %165, %157 : vector<8x256xf32>
    %167 = arith.select %164, %157, %166 : vector<8x256xi1>, vector<8x256xf32>
    %cst_47 = arith.constant dense<0.000000e+00> : vector<8xf32>
    %168 = vector.multi_reduction <add>, %162, %cst_47 [1] : vector<8x256xf32> to vector<8xf32>
    %169 = vector.shape_cast %168 : vector<8xf32> to vector<8x1xf32>
    %cst_48 = arith.constant 2.560000e+02 : f32
    %170 = vector.broadcast %cst_48 : f32 to vector<8x1xf32>
    %171 = arith.divf %169, %170 : vector<8x1xf32>
    %cst_49 = arith.constant dense<0.000000e+00> : vector<8xf32>
    %172 = vector.multi_reduction <add>, %167, %cst_49 [1] : vector<8x256xf32> to vector<8xf32>
    %173 = vector.shape_cast %172 : vector<8xf32> to vector<8x1xf32>
    %cst_50 = arith.constant 2.560000e+02 : f32
    %174 = vector.broadcast %cst_50 : f32 to vector<8x1xf32>
    %175 = arith.divf %173, %174 : vector<8x1xf32>
    %176 = tpu.concatenate %171, %175 in 0 : vector<8x1xf32>, vector<8x1xf32> -> vector<16x1xf32>
    %cst_51 = arith.constant dense<0.000000e+00> : vector<2x1xf32>
    %177 = tpu.matmul %3, %176, %cst_51 {dimension_numbers = #tpu.dot_dimension_numbers<[1], [0], [0], [1], [0, 0, 1, 1], [], []>} : vector<2x16xf32>, vector<16x1xf32>, vector<2x1xf32> -> vector<2x1xf32>
    %178 = arith.addf %177, %4 : vector<2x1xf32>
    %cst_52 = arith.constant dense<0.000000e+00> : vector<16x1xf32>
    %179 = tpu.matmul %5, %178, %cst_52 {dimension_numbers = #tpu.dot_dimension_numbers<[1], [0], [0], [1], [0, 0, 1, 1], [], []>} : vector<16x2xf32>, vector<2x1xf32>, vector<16x1xf32> -> vector<16x1xf32>
    %180 = arith.addf %179, %6 : vector<16x1xf32>
    %181 = arith.negf %180 : vector<16x1xf32>
    %182 = math.exp %181 : vector<16x1xf32>
    %cst_53 = arith.constant 1.000000e+00 : f32
    %183 = vector.broadcast %cst_53 : f32 to vector<16x1xf32>
    %184 = arith.addf %183, %182 : vector<16x1xf32>
    %185 = arith.divf %183, %184 : vector<16x1xf32>
    %186 = vector.extract_strided_slice %185 {offsets = [0, 0], sizes = [8, 1], strides = [1, 1]} : vector<16x1xf32> to vector<8x1xf32>
    %187 = vector.broadcast %186 : vector<8x1xf32> to vector<8x256xf32>
    %188 = arith.mulf %162, %187 : vector<8x256xf32>
    %189 = vector.extract_strided_slice %185 {offsets = [8, 0], sizes = [8, 1], strides = [1, 1]} : vector<16x1xf32> to vector<8x1xf32>
    %190 = vector.broadcast %189 : vector<8x1xf32> to vector<8x256xf32>
    %191 = arith.mulf %167, %190 : vector<8x256xf32>
    %192 = vector.extract_strided_slice %14 {offsets = [0, 0], sizes = [8, 256], strides = [1, 1]} : vector<16x256xf32> to vector<8x256xf32>
    %193 = arith.addf %188, %192 : vector<8x256xf32>
    %194 = vector.extract_strided_slice %14 {offsets = [8, 0], sizes = [8, 256], strides = [1, 1]} : vector<16x256xf32> to vector<8x256xf32>
    %195 = arith.addf %191, %194 : vector<8x256xf32>
    %c0_54 = arith.constant 0 : index
    %c0_55 = arith.constant 0 : index
    %c0_56 = arith.constant 0 : index
    %196 = vector.load %arg11[%c0_54, %c0_55, %c0_56] : memref<1x16x256xf32, #tpu.memory_space<vmem>>, vector<1x8x256xf32>
    %197 = vector.shape_cast %196 : vector<1x8x256xf32> to vector<8x256xf32>
    %198 = vector.shape_cast %193 : vector<8x256xf32> to vector<1x8x256xf32>
    tpu.vector_store %arg11[%c0_54, %c0_55, %c0_56], %198 {strides = array<i32>} : memref<1x16x256xf32, #tpu.memory_space<vmem>>, vector<1x8x256xf32>,
    %c0_57 = arith.constant 0 : index
    %c8_58 = arith.constant 8 : index
    %c0_59 = arith.constant 0 : index
    %199 = vector.load %arg11[%c0_57, %c8_58, %c0_59] : memref<1x16x256xf32, #tpu.memory_space<vmem>>, vector<1x8x256xf32>
    %200 = vector.shape_cast %199 : vector<1x8x256xf32> to vector<8x256xf32>
    %201 = vector.shape_cast %195 : vector<8x256xf32> to vector<1x8x256xf32>
    tpu.vector_store %arg11[%c0_57, %c8_58, %c0_59], %201 {strides = array<i32>} : memref<1x16x256xf32, #tpu.memory_space<vmem>>, vector<1x8x256xf32>,
    return
  }
  func.func @transform_0(%arg0: i32) -> (i32, i32, i32) {
    %c0_i32 = arith.constant 0 : i32
    %c0_i32_0 = arith.constant 0 : i32
    %c0_i32_1 = arith.constant 0 : i32
    return %arg0, %c0_i32, %c0_i32_0 : i32, i32, i32
  }
  func.func @transform_1(%arg0: i32) -> (i32, i32) {
    %c0_i32 = arith.constant 0 : i32
    %c0_i32_0 = arith.constant 0 : i32
    %c0_i32_1 = arith.constant 0 : i32
    return %c0_i32, %c0_i32_0 : i32, i32
  }
  func.func @transform_2(%arg0: i32) -> (i32, i32) {
    %c0_i32 = arith.constant 0 : i32
    %c0_i32_0 = arith.constant 0 : i32
    %c0_i32_1 = arith.constant 0 : i32
    return %c0_i32, %c0_i32_0 : i32, i32
  }
  func.func @transform_3(%arg0: i32) -> (i32, i32) {
    %c0_i32 = arith.constant 0 : i32
    %c0_i32_0 = arith.constant 0 : i32
    %c0_i32_1 = arith.constant 0 : i32
    return %c0_i32, %c0_i32_0 : i32, i32
  }
  func.func @transform_4(%arg0: i32) -> (i32, i32) {
    %c0_i32 = arith.constant 0 : i32
    %c0_i32_0 = arith.constant 0 : i32
    %c0_i32_1 = arith.constant 0 : i32
    return %c0_i32, %c0_i32_0 : i32, i32
  }
  func.func @transform_5(%arg0: i32) -> (i32, i32) {
    %c0_i32 = arith.constant 0 : i32
    %c0_i32_0 = arith.constant 0 : i32
    %c0_i32_1 = arith.constant 0 : i32
    return %c0_i32, %c0_i32_0 : i32, i32
  }
  func.func @transform_6(%arg0: i32) -> (i32, i32) {
    %c0_i32 = arith.constant 0 : i32
    %c0_i32_0 = arith.constant 0 : i32
    %c0_i32_1 = arith.constant 0 : i32
    return %c0_i32, %c0_i32_0 : i32, i32
  }
  func.func @transform_7(%arg0: i32) -> (i32, i32) {
    %c0_i32 = arith.constant 0 : i32
    %c0_i32_0 = arith.constant 0 : i32
    %c0_i32_1 = arith.constant 0 : i32
    return %c0_i32, %c0_i32_0 : i32, i32
  }
  func.func @transform_8(%arg0: i32) -> (i32, i32) {
    %c0_i32 = arith.constant 0 : i32
    %c0_i32_0 = arith.constant 0 : i32
    %c0_i32_1 = arith.constant 0 : i32
    return %c0_i32, %c0_i32_0 : i32, i32
  }
  func.func @transform_9(%arg0: i32) -> (i32, i32) {
    %c0_i32 = arith.constant 0 : i32
    %c0_i32_0 = arith.constant 0 : i32
    %c0_i32_1 = arith.constant 0 : i32
    return %c0_i32, %c0_i32_0 : i32, i32
  }
  func.func @transform_10(%arg0: i32) -> (i32, i32, i32) {
    %c0_i32 = arith.constant 0 : i32
    %c0_i32_0 = arith.constant 0 : i32
    %c0_i32_1 = arith.constant 0 : i32
    return %arg0, %c0_i32, %c0_i32_0 : i32, i32, i32
  }
}

</mosaic_0001>

<bundles_post_ra>
// kernel: tpu_custom_call.1
= control target key start
LH: loop header
LB: loop body
LE: loop exit
PB: predicated region body
PF: predicated region fallthrough
CT: control target
= control target key end

     0   :  { %s2214_s0 = inlined_call_operand.hbm [shape: f32[2,16,256], index: 0, kind: input, shape index: {}]   ;;  %s2215_s1 = inlined_call_operand.vmem [shape: f32[8,16], index: 1, kind: input, shape index: {}]   ;;  %s2216_s2 = inlined_call_operand.vmem [shape: f32[8,9], index: 2, kind: input, shape index: {}]   ;;  %s2217_s3 = inlined_call_operand.vmem [shape: f32[8,9], index: 3, kind: input, shape index: {}]   ;;  %s2218_s4 = inlined_call_operand.vmem [shape: f32[16,3], index: 4, kind: input, shape index: {}]   ;;  %s2219_s5 = inlined_call_operand.vmem [shape: f32[18,256], index: 5, kind: input, shape index: {}]   ;;  %s2220_s6 = inlined_call_operand.vmem [shape: f32[2,16], index: 6, kind: input, shape index: {}]   ;;  %s2221_s7 = inlined_call_operand.vmem [shape: f32[2,1], index: 7, kind: input, shape index: {}]   ;;  %s2222_s8 = inlined_call_operand.vmem [shape: f32[16,2], index: 8, kind: input, shape index: {}]   ;;  %s2223_s9 = inlined_call_operand.vmem [shape: f32[16,1], index: 9, kind: input, shape index: {}]   ;;  %s2224_s10 = inlined_call_operand.hbm [shape: f32[2,16,256], index: 10, kind: output, shape index: {}]  }
   0x1   :  { %2245 = sst [smem:[#allocation20_spill]] %s2214_s0 }
   0x2   :  { %2246 = sst [smem:[#allocation21_spill]] %s2215_s1 }
   0x3   :  { %15 = vsyncpa [#allocation3], 0 }
   0x4   :  { %17 = vsyncpa [#allocation3 + $0x1], 0 }
   0x5   :  { %18 = vsyncpa [#allocation4], 0 }
   0x6   :  { %20 = vsyncpa [#allocation4 + $0x1], 0  ;;  %s1650_s13 = smov 0   ;;  %s1652_s14 = smov 0  }
   0x7   :  { %s1654_s15 = smov 0   ;;  %s1656_s16 = smov 0  }
   0x8 LB: > { %s1671_s17 = sadd.s32 4294967295, %s1560_s16   ;;  %s1298_s18 = sadd.s32 4294967294, %s1560_s16   ;;  %s1560_s16 = sphi %s1656_s16, %s2294_s16   ;;  %s1556_s15 = sphi %s1654_s15, %s2293_s15   ;;  %s1552_s14 = sphi %s1652_s14, %s2292_s14   ;;  %s1548_s13 = sphi %s1650_s13, %s2291_s13  }
   0x9   : > { %s1675_s19 = sadd.s32 1, %s1560_s16   ;;  %s33_s20 = sadd.s32 1, %s1556_s15 }
   0xa   : > { %s30_s21 = ssub.s32 %s1560_s16, %s1675_s19  ;;  %p40_p0 = scmp.ne.s32.totalorder %s1556_s15, %s1552_s14 }
   0xb   : > { %p31_p1 = scmp.eq.s32.totalorder %s30_s21, 0  ;;  %p41_p2 = scmp.eq.s32.totalorder %s1560_s16, 0 }
   0xc   : > { %p46_p3 = scmp.ne.s32.totalorder %s1552_s14, %s1548_s13  ;;  %p47_p4 = scmp.eq.s32.totalorder %s1671_s17, 0 }
   0xd   : > { %s1687_s22 = scalar_select %p31_p1, %s1556_s15, %s33_s20  }
   0xe   : > { %p1689_p5 = por %p41_p2, %p40_p0  ;;  %p1693_p6 = por %p47_p4, %p46_p3 }
   0xf   : > { %2247 = sst [smem:[#allocation8_spill]] %s1687_s22  ;;  %p259_p7 = scmp.eq.s32.totalorder %s1671_s17, 1 }
  0x10   : > { %p265_p8 = scmp.eq.s32.totalorder %s1298_s18, 1  ;;  %p1373_p10 = scmp.lt.s32.totalorder %s1560_s16, 2 }
  0x11   : > { %p1700_p11 = por %p259_p7, %p40_p0  ;;  %s312_s27 = sand.u32 1, %s1556_s15  }
  0x12   : > { %p1704_p12 = por %p265_p8, %p46_p3  ;;  %s1334_s28 = sshll.u32 %s1560_s16, 9 }
  0x13   : > { %s2250_s25 = scalar_select %p1700_p11, 1, 0 }
  0x14   : > { %s2251_s26 = scalar_select %p1704_p12, 1, 0 }
  0x15   : > { %s1301_s29 = sshll.u32 %s312_s27, 5  ;;  %s2252_s0 = sld [smem:[#allocation20_spill]] }
  0x16   : > { %s316_s18 = scalar_lea.vmem [#allocation2], %s1301_s29  ;;  %p1717_p13 = pnand %p1373_p10, %p1689_p5 }
  0x17   : > { %s323_s20 = sshll.u32 %s316_s18, 4  ;;  %s1723_s22 = scalar_lea.sflag [#allocation3], %s312_s27  ;;  %s1721_s20 = int_to_ptr.vmem [resolvable:$true] %s323_s20 }
  0x18   : > { %p1466_p1 = pneg %p1717_p13 }
  0x1b   : > { %s1713_s12 = scalar_lea.hbm %s2252_s0, %s1334_s28  ;;  %s1469_s29 = scalar_lea.hbm %s2252_s0, 1024 }
  0x1c   : > { %s1464_s30 = scalar_lea.hbm %s1713_s12, 512  ;;  %p1470_p4 = scmp.lt.u32.totalorder %s1713_s12, %s2252_s0 }
  0x1d   : > { %p1465_p0 = scmp.ne.s32.totalorder %s1713_s12, %s1464_s30  ;;  %p1471_p5 = scmp.lt.u32.totalorder %s1469_s29, %s1464_s30 }
  0x1e   : > { %p1473_p8 = scmp.lt.u32.totalorder %s1464_s30, %s1713_s12 }
  0x1f   : > { %p1467_p2 = pnand %p1466_p1, %p1465_p0  ;;  %p1472_p7 = por %p1471_p5, %p1470_p4 }
  0x21   : > { %p1468_p3 = pneg %p1467_p2  ;;  %p1474_p10 = por %p1473_p8, %p1472_p7 }
  0x23   : > { %p1475_p9 = pnand %p1474_p10, %p1468_p3 }
  0x25   : > { %1478 = shalt.err (!%p1475_p9)
}
  0x26   : > { %s1479_s27 = scalar_lea.vmem %s1721_s20, 512  ;;  %s1562_s28 = smov [#allocation2]  }
  0x27   : > { %p1480_p0 = scmp.ne.s32.totalorder %s1721_s20, %s1479_s27  ;;  %s1484_s23 = sshll.u32 %s1562_s28, 4  ;;  %s1485_s23 = int_to_ptr.vmem [resolvable:$false] %s1484_s23 }
  0x28   : > { %s1486_s11 = scalar_lea.vmem %s1485_s23, 1024  ;;  %p1487_p11 = scmp.lt.s32.totalorder %s1721_s20, %s1485_s23 }
  0x29   : > { %p1482_p2 = pnand %p1480_p0, %p1466_p1  ;;  %p1488_p4 = scmp.lt.s32.totalorder %s1486_s11, %s1479_s27 }
  0x2b   : > { %p1483_p12 = pneg %p1482_p2  ;;  %p1489_p5 = por %p1488_p4, %p1487_p11 }
  0x2d   : > { %p1490_p7 = pnand %p1489_p5, %p1483_p12 }
  0x2f   : > { %1493 = shalt.err (!%p1490_p7)
}
  0x30   : > { %s1563_s30 = smov 256   ;;  %s1564_s29 = smov 16  }
  0x31   : > { %1368 = dma.hbm_to_vmem [thread:$0]  (!%p1717_p13), %s1713_s12, 512, %s1721_s20, %s1723_s22, %s1563_s30, %s1563_s30, %s1564_s29  }
  0x32   : > { %p1304_p9 = scmp.ge.s32.totalorder %s1560_s16, 1  ;;  %p331_p1 = scmp.lt.s32.totalorder %s1560_s16, 3 }
  0x34   : > { %p332_p3 = pnand %p1304_p9, %p331_p1 }
  0x36   : > { %335 = sbr.rel (%p332_p3) target bundleno = 1255 (0x4e7), region = 60 }
  0x3d   : > { %s1754_s18 = sand.u32 1, %s1552_s14  }
  0x3e   : > { %s2226_s27 = sshll.u32 %s1754_s18, 5  ;;  %s338_s28 = scalar_lea.sflag [#allocation3], %s1754_s18 }
  0x3f   : > { %s341_s23 = scalar_lea.vmem [#allocation2], %s2226_s27 }
  0x40   : > { %1539 = dma.done.wait (%p1693_p6), %s338_s28, 512  }
  0x41   : > { %1541 = vsyncadd (%p1693_p6), %s338_s28, 4294966784  ;;  %v2233_v0 = vmov 0.0   ;;  %v1566_v1 = vmov 4   ;;  %v1567_v2 = vmov 2   ;;  %v1765_v3 = vld [vmem:[%s341_s23 + $0x8] sm:$0xff]  ;;  %v1767_v4 = vld [vmem:[%s341_s23 + $0x18] sm:$0xff]  ;;  %v486_v56 = vlaneseq }
  0x42   : > { %461 = vmatprep.mubr.f32.mxu0 %v2233_v0  ;;  %1438 = vset.pattern.permute.xlu1 %v1566_v1  ;;  %2254 = vst [vmem:[#allocation9_spill] sm:$0xff] %v1765_v3  ;;  %2255 = vst [vmem:[#allocation10_spill] sm:$0xff] %v1767_v4  ;;  %v1769_v5 = vld [vmem:[%s341_s23] sm:$0xff]  ;;  %v1354_v6 = vpack.c.bf16 %v1767_v4, %v1765_v3  ;;  %v1773_v7 = vld [vmem:[%s341_s23 + $0x10] sm:$0xff]  ;;  %s2258_s1 = sld [smem:[#allocation21_spill]]  ;;  %vm393_vm0 = vcmask 130048  }
  0x43   : > { %1441 = vset.pattern.permute.xlu0 %v1567_v2  ;;  %2256 = vst [vmem:[#allocation11_spill] sm:$0xff] %v1769_v5  ;;  %2257 = vst [vmem:[#allocation12_spill] sm:$0xff] %v1773_v7  ;;  %v379_v8 = vld [vmem:[%s2216_s2] sm:$0xff]  ;;  %v1356_v9 = vpack.c.bf16 %v1773_v7, %v1769_v5  ;;  %v1568_v12 = vmov 5   ;;  %v1569_v13 = vmov 1   ;;  %v1570_v14 = vmov 6  }
  0x44   : > { %470 = vperm.xlu1 %1438, %v379_v8   ;;  %v380_v10 = vld [vmem:[%s2217_s3] sm:$0xff]  ;;  %1355 = vmatprep.subr.bf16.mxu0 %v1354_v6  ;;  %v1571_v15 = vmov 3   ;;  %v1572_v16 = vmov 7   ;;  %v1573_v17 = vmov 8   ;;  %v1574_v18 = vmov 0   ;;  %v1791_v19 = vld [vmem:[%s2218_s4 + $0x8] sm:$0xff] }
  0x45   : > { %804 = vperm.xlu0 %1441, %v380_v10   ;;  %1357 = vmatpush1.bf16.msra.mxu0 %v1356_v9  ;;  %v1798_v20 = vld [vmem:[%s2218_s4] sm:$0xff]  ;;  %s2231_s22 = smov 34   ;;  %s1576_s24 = smov 17   ;;  %v494_v59 = vshrl.u32 %v486_v56, 7 }
  0x46   : > { %s1577_s12 = smov 16   ;;  %s2229_s20 = smov 32   ;;  %v1316_v1 = vld [vmem:[%s2219_s5 + $0x12] ss:$8 sm:$0x3] }
  0x47   : > { %s2227_s21 = smov 15   ;;  %s2228_s11 = smov 2   ;;  %v1923_v62 = vsub.s32 0, %v494_v59  ;;  %v1925_v63 = vsub.s32 1, %v494_v59 }
  0x48   : > { %v378_v11 = vld [vmem:[%s2258_s1] sm:$0xff]  ;;  %477 = vperm.xlu1 %1438, %v380_v10   ;;  %s1581_s30 = smov 30   ;;  %s2230_s29 = smov 126  }
  0x49   : > { %1307 = vmatmul.mubr.msk.f32.vlgmr.msra.gmra.mrb[0].mxu0 %vm393_vm0, %v378_v11  ;;  %1443 = vset.pattern.permute.xlu0 %v1568_v12  ;;  %s1583_s28 = smov 1   ;;  %s2232_s23 = smov 113   ;;  %v1938_v6 = vld [vmem:[%s2219_s5 + $0x2] ss:$8 sm:$0x3]  ;;  %v766_v11 = vrot.slane %v1316_v1, %v1923_v62  ;;  %v770_v12 = vrot.slane %v1316_v1, %v1925_v63 }
  0x4a   : > { %624 = vperm.xlu0 %1443, %v379_v8   ;;  %s1585_s27 = smov 127   ;;  %s2260_s0 = smov 32   ;;  %v560_v3 = vrot.slane %v1938_v6, %v1925_v63 }
  0x4b   : > { %s2261_s1 = smov 15   ;;  %p2287_p11 = scmp.ne.s32.totalorder %s2250_s25, 0 }
  0x4c   : > { %1439 = vset.pattern.permute.xlu1 %v1569_v13 }
  0x4d   : > { %774 = vperm.xlu1 %1439, %v380_v10  }
  0x4e   : > { %864 = vperm.xlu0 %1443, %v380_v10  }
  0x51   : > { %1440 = vset.pattern.permute.xlu1 %v1567_v2 }
  0x52   : > { %1445 = vset.pattern.permute.xlu0 %v1570_v14  ;;  %564 = vperm.xlu1 %1440, %v379_v8  }
  0x53   : > { %894 = vperm.xlu0 %1445, %v380_v10  }
  0x56   : > { %1442 = vset.pattern.permute.xlu1 %v1571_v15 }
  0x57   : > { %1446 = vset.pattern.permute.xlu0 %v1572_v16  ;;  %594 = vperm.xlu1 %1442, %v379_v8  }
  0x58   : > { %684 = vperm.xlu0 %1446, %v379_v8  }
  0x5b   : > { %834 = vperm.xlu1 %1442, %v380_v10  }
  0x5c   : > { %924 = vperm.xlu0 %1446, %v380_v10  }
  0x5f   : > { %1444 = vset.pattern.permute.xlu1 %v1570_v14  ;;  %v556_v14 = vrot.slane %v1938_v6, %v1923_v62 }
  0x60   : > { %1448 = vset.pattern.permute.xlu0 %v1573_v17  ;;  %654 = vperm.xlu1 %1444, %v379_v8  }
  0x61   : > { %954 = vperm.xlu0 %1448, %v380_v10  }
  0x64   : > { %1447 = vset.pattern.permute.xlu1 %v1573_v17  ;;  %v1310_v17 = vld [vmem:[%s2219_s5 + $0x3] ss:$8 sm:$0x3] }
  0x65   : > { %1449 = vset.pattern.permute.xlu0 %v1574_v18  ;;  %714 = vperm.xlu1 %1447, %v379_v8   ;;  %v586_v5 = vrot.slane %v1310_v17, %v1923_v62 }
  0x66   : > { %504 = vperm.xlu0 %1449, %v379_v8  }
  0x69   : > { %1451 = vset.pattern.permute.xlu1 %v1574_v18 }
  0x6a   : > { %744 = vperm.xlu0 %1449, %v380_v10   ;;  %978 = vperm.xlu1 %1451, %v1791_v19   ;;  %v1945_v10 = vand.u32 127, %v486_v56  ;;  %v1308_v56 = vld [vmem:[%s2219_s5 + $0x1] ss:$8 sm:$0x3] }
  0x6b   : > { %v526_v4 = vrot.slane %v1308_v56, %v1923_v62  ;;  %v530_v7 = vrot.slane %v1308_v56, %v1925_v63 }
  0x6c   : > { %vm488_vm1 = vcmp.lt.s32.totalorder %v1945_v10, 17  ;;  %vm727_vm2 = vcmp.lt.s32.totalorder %v1945_v10, 34  ;;  %vm517_vm3 = vcmp.lt.s32.totalorder %v1945_v10, 16  ;;  %vm757_vm4 = vcmp.lt.s32.totalorder %v1945_v10, 32 }
  0x6d   : > { %vm577_vm5 = vcmp.lt.s32.totalorder %v1945_v10, 1  ;;  %vm547_vm6 = vcmp.lt.s32.totalorder %v1945_v10, 15  ;;  %vm787_vm7 = vcmp.lt.s32.totalorder %v1945_v10, 30  ;;  %vm817_vm8 = vcmp.lt.s32.totalorder %v1945_v10, 2 }
  0x6e   : > { %965 = vperm.xlu0 %1449, %v1798_v20   ;;  %1452 = vset.pattern.permute.xlu1 %v1569_v13  ;;  %vm607_vm9 = vcmp.lt.s32.totalorder %v1945_v10, 127  ;;  %vm847_vm10 = vcmp.lt.s32.totalorder %v1945_v10, 126  ;;  %vm637_vm11 = vcmp.lt.s32.totalorder %v1945_v10, 113  ;;  %vm877_vm12 = vcmp.lt.s32.totalorder %v1945_v10, 98 }
  0x6f   : > { %971 = vperm.xlu1 %1452, %v1798_v20   ;;  %vm697_vm13 = vcmp.lt.s32.totalorder %v1945_v10, 111  ;;  %vm667_vm14 = vcmp.lt.s32.totalorder %v1945_v10, 112  ;;  %vm937_vm15 = vcmp.lt.s32.totalorder %v1945_v10, 94 }
  0x72   : > { %1450 = vset.pattern.permute.xlu0 %v1569_v13  ;;  %v1315_v13 = vld [vmem:[%s2219_s5 + $0x11] ss:$8 sm:$0x3] }
  0x73   : > { %534 = vperm.xlu0 %1450, %v379_v8   ;;  %1453 = vset.pattern.permute.xlu1 %v1567_v2  ;;  %v1933_v2 = vld [vmem:[%s2219_s5 + $0x13] ss:$8 sm:$0x3]  ;;  %v491_v8 = vld [vmem:[%s2219_s5] ss:$8 sm:$0x3] }
  0xc3   : > { %v1802_v21 = vpop.permute.xlu1 %470 }
  0xc4   : > { %v1853_v27 = vpop.permute.xlu0 %804 }
  0xc7   : > { %v478_v22 = vpop.permute.xlu1 %477 }
  0xc9   : > { %v1858_v28 = vpop.permute.xlu0 %624 }
  0xcc   : > { %v775_v31 = vpop.permute.xlu1 %774 }
  0xcd   : > { %v1863_v29 = vpop.permute.xlu0 %864  ;;  %v777_v0 = vmul.f32 %v775_v31, %v766_v11  ;;  %v778_v16 = vmul.f32 %v775_v31, %v770_v12 }
  0xd1   : > { %v1873_v33 = vpop.permute.xlu1 %564 }
  0xd2   : > { %v1867_v30 = vpop.permute.xlu0 %894 }
  0xd6   : > { %v1878_v35 = vpop.permute.xlu1 %594 }
  0xd7   : > { %v1871_v32 = vpop.permute.xlu0 %684 }
  0xda   : > { %v1884_v37 = vpop.permute.xlu1 %834 }
  0xdb   : > { %v1876_v34 = vpop.permute.xlu0 %924 }
  0xdc   : > { %2265 = vst [vmem:[#allocation13_spill] sm:$0xff] %v1876_v34 }
  0xdf   : > { %v1887_v39 = vpop.permute.xlu1 %654 }
  0xe0   : > { %v1882_v36 = vpop.permute.xlu0 %954 }
  0xe1   : > { %2266 = vst [vmem:[#allocation14_spill] sm:$0xff] %v1882_v36 }
  0xe4   : > { %v1889_v41 = vpop.permute.xlu1 %714 }
  0xe5   : > { %v505_v38 = vpop.permute.xlu0 %504 }
  0xe9   : > { %v745_v40 = vpop.permute.xlu0 %744  ;;  %v1893_v43 = vpop.permute.xlu1 %978 }
  0xea   : > { %2268 = vst [vmem:[#allocation16_spill] sm:$0xff] %v1893_v43 }
  0xed   : > { %v1891_v42 = vpop.permute.xlu0 %965 }
  0xee   : > { %2267 = vst [vmem:[#allocation15_spill] sm:$0xff] %v1891_v42  ;;  %v1897_v45 = vpop.permute.xlu1 %971 }
  0xef   : > { %2269 = vst [vmem:[#allocation17_spill] sm:$0xff] %v1897_v45 }
  0xf2   : > { %v1895_v44 = vpop.permute.xlu0 %534 }
  0xf3   : > { %v537_v56 = vmul.f32 %v1895_v44, %v526_v4 }
 0x11c   : > { %v1804_v23 = vpop.f32.mrb[0].mxu0 }
 0x11d   : > { %723 = vrot.lane.b32.xlu1 %v1804_v23, %s2231_s22  ;;  %482 = vrot.lane.b32.xlu0 %v1804_v23, %s1576_s24  ;;  %v1810_v24 = vpop.f32.mrb[1].mxu0  ;;  %v1813_v25 = vmul.f32 %v478_v22, %v1804_v23  ;;  %s1590_s22 = smov 96  }
 0x11e   : > { %v1816_v26 = vmul.f32 %v478_v22, %v1810_v24  ;;  %v740_v22 = vrot.slane %v1315_v13, %v1925_v63 }
 0x120   : > { %v748_v12 = vmul.f32 %v745_v40, %v740_v22 }
 0x121   : > { %513 = vrot.lane.b32.xlu1 %v1804_v23, %s1577_s12  ;;  %753 = vrot.lane.b32.xlu0 %v1804_v23, %s2229_s20  ;;  %s1588_s20 = smov 112  }
 0x125   : > { %543 = vrot.lane.b32.xlu1 %v1804_v23, %s2227_s21  ;;  %813 = vrot.lane.b32.xlu0 %v1804_v23, %s2228_s11  ;;  %s1586_s21 = smov 98   ;;  %s1587_s11 = smov 111  }
 0x129   : > { %783 = vrot.lane.b32.xlu1 %v1804_v23, %s1581_s30  ;;  %843 = vrot.lane.b32.xlu0 %v1804_v23, %s2230_s29  ;;  %s1589_s29 = smov 94  }
 0x12d   : > { %573 = vrot.lane.b32.xlu1 %v1804_v23, %s1583_s28  ;;  %633 = vrot.lane.b32.xlu0 %v1804_v23, %s2232_s23  ;;  %s2259_s23 = smov 34  }
 0x131   : > { %603 = vrot.lane.b32.xlu1 %v1804_v23, %s1585_s27  ;;  %873 = vrot.lane.b32.xlu0 %v1804_v23, %s1586_s21 }
 0x135   : > { %693 = vrot.lane.b32.xlu1 %v1804_v23, %s1587_s11  ;;  %663 = vrot.lane.b32.xlu0 %v1804_v23, %s1588_s20 }
 0x139   : > { %933 = vrot.lane.b32.xlu1 %v1804_v23, %s1589_s29  ;;  %903 = vrot.lane.b32.xlu0 %v1804_v23, %s1590_s22 }
 0x13d   : > { %515 = vrot.lane.b32.xlu0 %v1810_v24, %s1577_s12  ;;  %484 = vrot.lane.b32.xlu1 %v1810_v24, %s1576_s24  ;;  %s2262_s24 = smov 2  }
 0x141   : > { %575 = vrot.lane.b32.xlu0 %v1810_v24, %s1583_s28  ;;  %725 = vrot.lane.b32.xlu1 %v1810_v24, %s2259_s23  ;;  %s2282_s23 = sshll.u32 %s1754_s18, 5 }
 0x145   : > { %695 = vrot.lane.b32.xlu0 %v1810_v24, %s1587_s11  ;;  %755 = vrot.lane.b32.xlu1 %v1810_v24, %s2260_s0  ;;  %s2263_s0 = smov 126   ;;  %s1593_s11 = smov [#allocation5]  }
 0x149   : > { %935 = vrot.lane.b32.xlu0 %v1810_v24, %s1589_s29  ;;  %545 = vrot.lane.b32.xlu1 %v1810_v24, %s2261_s1  ;;  %s2264_s1 = smov 113  }
 0x14d   : > { %984 = vperm.xlu0 %1450, %v1791_v19   ;;  %785 = vrot.lane.b32.xlu1 %v1810_v24, %s1581_s30  ;;  %s1498_s30 = sshll.u32 %s1593_s11, 4  ;;  %s1499_s30 = int_to_ptr.vmem [resolvable:$false] %s1498_s30 }
 0x14e   : > { %s1500_s29 = scalar_lea.vmem %s1499_s30, 1024 }
 0x151   : > { %815 = vrot.lane.b32.xlu1 %v1810_v24, %s2262_s24  ;;  %1454 = vset.pattern.permute.xlu0 %v1574_v18  ;;  %s377_s24 = scalar_lea.vmem [#allocation5], %s2282_s23 }
 0x155   : > { %605 = vrot.lane.b32.xlu1 %v1810_v24, %s1585_s27 }
 0x159   : > { %845 = vrot.lane.b32.xlu1 %v1810_v24, %s2263_s0  ;;  %s1225_s0 = sshll.u32 %s377_s24, 4  ;;  %s2160_s0 = int_to_ptr.vmem [resolvable:$true] %s1225_s0 }
 0x15a   : > { %p1501_p8 = scmp.lt.s32.totalorder %s2160_s0, %s1499_s30 }
 0x15d   : > { %635 = vrot.lane.b32.xlu1 %v1810_v24, %s2264_s1  ;;  %s1335_s1 = sshll.u32 %s1671_s17, 9 }
 0x161   : > { %875 = vrot.lane.b32.xlu1 %v1810_v24, %s1586_s21  ;;  %s1494_s21 = scalar_lea.vmem %s2160_s0, 512 }
 0x162   : > { %p1495_p6 = scmp.ne.s32.totalorder %s2160_s0, %s1494_s21  ;;  %p1502_p10 = scmp.lt.s32.totalorder %s1500_s29, %s1494_s21 }
 0x164   : > { %p1496_p12 = pnand %p1495_p6, %p2287_p11  ;;  %p1503_p0 = por %p1502_p10, %p1501_p8 }
 0x165   : > { %665 = vrot.lane.b32.xlu1 %v1810_v24, %s1588_s20  ;;  %s1212_s20 = scalar_lea.sflag [#allocation4], %s1754_s18 }
 0x166   : > { %p1497_p13 = pneg %p1496_p12 }
 0x168   : > { %p1504_p2 = pnand %p1503_p0, %p1497_p13 }
 0x169   : > { %905 = vrot.lane.b32.xlu1 %v1810_v24, %s1590_s22  ;;  %s2169_s22 = scalar_lea.hbm %s2224_s10, %s1335_s1 }
 0x16d   : > { %992 = vperm.xlu1 %1453, %v1798_v20   ;;  %v736_v20 = vrot.slane %v1315_v13, %v1923_v62  ;;  %v590_v13 = vrot.slane %v1310_v17, %v1925_v63 }
 0x16f   : > { %v747_v31 = vmul.f32 %v745_v40, %v736_v20  ;;  %v474_v40 = vmul.f32 %v1802_v21, %v1810_v24 }
 0x171   : > { %1002 = vperm.xlu1 %1453, %v1791_v19   ;;  %v500_v19 = vrot.slane %v491_v8, %v1925_v63 }
 0x173   : > { %v508_v11 = vmul.f32 %v505_v38, %v500_v19 }
 0x175   : > { %1455 = vset.pattern.permute.xlu1 %v1574_v18  ;;  %v496_v18 = vrot.slane %v491_v8, %v1923_v62  ;;  %v567_v8 = vmul.f32 %v1873_v33, %v556_v14 }
 0x177   : > { %v507_v1 = vmul.f32 %v505_v38, %v496_v18  ;;  %v473_v38 = vmul.f32 %v1802_v21, %v1804_v23 }
 0x18f   : > { %v724_v46 = vpop.permute.xlu1 %723  ;;  %v483_v47 = vpop.permute.xlu0 %482 }
 0x193   : > { %v1899_v48 = vpop.permute.xlu1 %513  ;;  %v1901_v49 = vpop.permute.xlu0 %753 }
 0x197   : > { %v1903_v50 = vpop.permute.xlu1 %543  ;;  %v1905_v51 = vpop.permute.xlu0 %813 }
 0x19b   : > { %v1907_v52 = vpop.permute.xlu1 %783  ;;  %v1909_v53 = vpop.permute.xlu0 %843 }
 0x19f   : > { %v1911_v54 = vpop.permute.xlu1 %573  ;;  %v1913_v55 = vpop.permute.xlu0 %633 }
 0x1a3   : > { %v1915_v57 = vpop.permute.xlu1 %603  ;;  %v1917_v58 = vpop.permute.xlu0 %873 }
 0x1a7   : > { %v1919_v60 = vpop.permute.xlu1 %693  ;;  %v1921_v61 = vpop.permute.xlu0 %663 }
 0x1ab   : > { %v1943_v9 = vpop.permute.xlu1 %933  ;;  %v1954_v15 = vpop.permute.xlu0 %903 }
 0x1ac   : > { %2270 = vst [vmem:[#allocation18_spill] sm:$0xff] %v1943_v9  ;;  %2271 = vst [vmem:[#allocation19_spill] sm:$0xff] %v1954_v15 }
 0x1af   : > { %v485_v59 = vpop.permute.xlu1 %484  ;;  %v516_v42 = vpop.permute.xlu0 %515 }
 0x1b0   : > { %v489_v43 = vsel %vm488_vm1, %v483_v47, %v485_v59  ;;  %v490_v45 = vsel %vm488_vm1, %v485_v59, %v483_v47  ;;  %v538_v47 = vmul.f32 %v1895_v44, %v530_v7  ;;  %v518_v4 = vsel %vm517_vm3, %v1899_v48, %v516_v42 }
 0x1b1   : > { %v509_v17 = vmul.f32 %v507_v1, %v490_v45  ;;  %v510_v9 = vmul.f32 %v508_v11, %v489_v43  ;;  %v519_v7 = vsel %vm517_vm3, %v516_v42, %v1899_v48  ;;  %v568_v43 = vmul.f32 %v1873_v33, %v560_v3  ;;  %v1318_v42 = vld [vmem:[%s2219_s5 + $0x14] ss:$8 sm:$0x3] }
 0x1b2   : > { %v597_v44 = vmul.f32 %v1878_v35, %v586_v5  ;;  %v539_v48 = vmul.f32 %v537_v56, %v519_v7  ;;  %v540_v19 = vmul.f32 %v538_v47, %v518_v4  ;;  %v2272_v1 = vrot.slane %v1933_v2, %v1923_v62  ;;  %v1319_v4 = vld [vmem:[%s2219_s5 + $0x16] ss:$8 sm:$0x3] }
 0x1b3   : > { %v726_v6 = vpop.permute.xlu1 %725  ;;  %v511_v24 = vadd.f32 %v509_v17, %v473_v38  ;;  %vm907_vm1 = vcmp.lt.s32.totalorder %v1945_v10, 96 }
 0x1b4   : > { %v728_v14 = vsel %vm727_vm2, %v724_v46, %v726_v6  ;;  %v729_v15 = vsel %vm727_vm2, %v726_v6, %v724_v46 }
 0x1b5   : > { %v749_v36 = vmul.f32 %v747_v31, %v729_v15  ;;  %v750_v34 = vmul.f32 %v748_v12, %v728_v14  ;;  %v598_v15 = vmul.f32 %v1878_v35, %v590_v13  ;;  %v541_v35 = vadd.f32 %v539_v48, %v511_v24 }
 0x1b6   : > { %v807_v13 = vmul.f32 %v1853_v27, %v2272_v1  ;;  %v826_v31 = vrot.slane %v1318_v42, %v1923_v62  ;;  %v830_v12 = vrot.slane %v1318_v42, %v1925_v63 }
 0x1b7   : > { %v751_v46 = vadd.f32 %v749_v36, %v1813_v25  ;;  %v752_v18 = vadd.f32 %v750_v34, %v1816_v26  ;;  %v756_v45 = vpop.permute.xlu1 %755  ;;  %v512_v25 = vadd.f32 %v510_v9, %v474_v40  ;;  %v576_v26 = vpop.permute.xlu0 %575 }
 0x1b8   : > { %v758_v21 = vsel %vm757_vm4, %v1901_v49, %v756_v45  ;;  %v759_v23 = vsel %vm757_vm4, %v756_v45, %v1901_v49  ;;  %v579_v3 = vsel %vm577_vm5, %v576_v26, %v1911_v54  ;;  %v837_v7 = vmul.f32 %v1884_v37, %v826_v31  ;;  %v1313_v31 = vld [vmem:[%s2219_s5 + $0x7] ss:$8 sm:$0x3] }
 0x1b9   : > { %v779_v34 = vmul.f32 %v777_v0, %v759_v23  ;;  %v780_v36 = vmul.f32 %v778_v16, %v758_v21  ;;  %v578_v0 = vsel %vm577_vm5, %v1911_v54, %v576_v26  ;;  %v542_v16 = vadd.f32 %v540_v19, %v512_v25 }
 0x1ba   : > { %v2273_v54 = vrot.slane %v1933_v2, %v1925_v63  ;;  %v600_v6 = vmul.f32 %v598_v15, %v578_v0  ;;  %v838_v21 = vmul.f32 %v1884_v37, %v830_v12 }
 0x1bb   : > { %v781_v49 = vadd.f32 %v779_v34, %v751_v46  ;;  %v782_v20 = vadd.f32 %v780_v36, %v752_v18  ;;  %v546_v9 = vpop.permute.xlu1 %545 }
 0x1bc   : > { %v548_v5 = vsel %vm547_vm6, %v1903_v50, %v546_v9  ;;  %v549_v33 = vsel %vm547_vm6, %v546_v9, %v1903_v50  ;;  %v808_v11 = vmul.f32 %v1853_v27, %v2273_v54  ;;  %v1311_v50 = vld [vmem:[%s2219_s5 + $0x5] ss:$8 sm:$0x3]  ;;  %vm1592_vm6 = vmmov 0  }
 0x1bd   : > { %v569_v22 = vmul.f32 %v567_v8, %v549_v33  ;;  %v570_v59 = vmul.f32 %v568_v43, %v548_v5  ;;  %v599_v8 = vmul.f32 %v597_v44, %v579_v3  ;;  %v616_v18 = vrot.slane %v1311_v50, %v1923_v62 }
 0x1be   : > { %v620_v45 = vrot.slane %v1311_v50, %v1925_v63  ;;  %v856_v43 = vrot.slane %v1319_v4, %v1923_v62  ;;  %v860_v44 = vrot.slane %v1319_v4, %v1925_v63  ;;  %v696_v4 = vpop.permute.xlu0 %695 }
 0x1bf   : > { %v571_v14 = vadd.f32 %v569_v22, %v541_v35  ;;  %v572_v17 = vadd.f32 %v570_v59, %v542_v16  ;;  %v786_v56 = vpop.permute.xlu1 %785  ;;  %v627_v15 = vmul.f32 %v1858_v28, %v616_v18 }
 0x1c0   : > { %v788_v47 = vsel %vm787_vm7, %v1907_v52, %v786_v56  ;;  %v789_v27 = vsel %vm787_vm7, %v786_v56, %v1907_v52  ;;  %v628_v42 = vmul.f32 %v1858_v28, %v620_v45  ;;  %v867_v3 = vmul.f32 %v1863_v29, %v856_v43  ;;  %v1320_v28 = vld [vmem:[%s2219_s5 + $0x17] ss:$8 sm:$0x3] }
 0x1c1   : > { %v809_v2 = vmul.f32 %v807_v13, %v789_v27  ;;  %v810_v38 = vmul.f32 %v808_v11, %v788_v47  ;;  %v601_v40 = vadd.f32 %v599_v8, %v571_v14  ;;  %v602_v46 = vadd.f32 %v600_v6, %v572_v17  ;;  %v1321_v47 = vld [vmem:[%s2219_s5 + $0x20] ss:$8 sm:$0x3] }
 0x1c2   : > { %v868_v5 = vmul.f32 %v1863_v29, %v860_v44  ;;  %v886_v29 = vrot.slane %v1320_v28, %v1923_v62  ;;  %v890_v11 = vrot.slane %v1320_v28, %v1925_v63  ;;  %vm1091_vm7 = vcmask 15360  }
 0x1c3   : > { %v811_v23 = vadd.f32 %v809_v2, %v781_v49  ;;  %v812_v52 = vadd.f32 %v810_v38, %v782_v20  ;;  %v816_v24 = vpop.permute.xlu1 %815  ;;  %v1312_v49 = vld [vmem:[%s2219_s5 + $0x6] ss:$8 sm:$0x3] }
 0x1c4   : > { %v818_v25 = vsel %vm817_vm8, %v1905_v51, %v816_v24  ;;  %v819_v26 = vsel %vm817_vm8, %v816_v24, %v1905_v51  ;;  %v646_v33 = vrot.slane %v1312_v49, %v1923_v62  ;;  %v650_v35 = vrot.slane %v1312_v49, %v1925_v63 }
 0x1c5   : > { %v839_v34 = vmul.f32 %v837_v7, %v819_v26  ;;  %v840_v36 = vmul.f32 %v838_v21, %v818_v25  ;;  %v898_v38 = vmul.f32 %v1867_v30, %v890_v11  ;;  %v698_v49 = vsel %vm697_vm13, %v1919_v60, %v696_v4 }
 0x1c6   : > { %v657_v12 = vmul.f32 %v1887_v39, %v646_v33  ;;  %v658_v50 = vmul.f32 %v1887_v39, %v650_v35  ;;  %v897_v39 = vmul.f32 %v1867_v30, %v886_v29  ;;  %v920_v30 = vrot.slane %v1321_v47, %v1925_v63 }
 0x1c7   : > { %v841_v37 = vadd.f32 %v839_v34, %v811_v23  ;;  %v842_v48 = vadd.f32 %v840_v36, %v812_v52  ;;  %v606_v19 = vpop.permute.xlu1 %605  ;;  %v916_v52 = vrot.slane %v1321_v47, %v1923_v62  ;;  %vm1098_vm8 = vcmask 1041408  }
 0x1c8   : > { %v608_v51 = vsel %vm607_vm9, %v1915_v57, %v606_v19  ;;  %v609_v20 = vsel %vm607_vm9, %v606_v19, %v1915_v57 }
 0x1c9   : > { %v629_v9 = vmul.f32 %v627_v15, %v608_v51  ;;  %v630_v0 = vmul.f32 %v628_v42, %v609_v20  ;;  %v699_v51 = vsel %vm697_vm13, %v696_v4, %v1919_v60 }
 0x1cb   : > { %v631_v16 = vadd.f32 %v629_v9, %v601_v40  ;;  %v632_v22 = vadd.f32 %v630_v0, %v602_v46  ;;  %v846_v59 = vpop.permute.xlu1 %845  ;;  %v676_v40 = vrot.slane %v1313_v31, %v1923_v62  ;;  %v680_v46 = vrot.slane %v1313_v31, %v1925_v63  ;;  %v2274_v0 = vld [vmem:[#allocation13_spill] sm:$0xff] }
 0x1cc   : > { %v848_v57 = vsel %vm847_vm10, %v1909_v53, %v846_v59  ;;  %v849_v1 = vsel %vm847_vm10, %v846_v59, %v1909_v53  ;;  %v1314_v53 = vld [vmem:[%s2219_s5 + $0x10] ss:$8 sm:$0x3]  ;;  %v2276_v59 = vld [vmem:[#allocation18_spill] sm:$0xff] }
 0x1cd   : > { %v869_v13 = vmul.f32 %v867_v3, %v848_v57  ;;  %v870_v54 = vmul.f32 %v868_v5, %v849_v1  ;;  %v706_v18 = vrot.slane %v1314_v53, %v1923_v62  ;;  %v710_v45 = vrot.slane %v1314_v53, %v1925_v63  ;;  %v2275_v5 = vld [vmem:[#allocation14_spill] sm:$0xff] }
 0x1ce   : > { %v687_v36 = vmul.f32 %v1871_v32, %v676_v40  ;;  %v688_v43 = vmul.f32 %v1871_v32, %v680_v46  ;;  %v936_v32 = vpop.permute.xlu0 %935  ;;  %v928_v3 = vmul.f32 %v2274_v0, %v920_v30  ;;  %v2280_v40 = vld [vmem:[#allocation16_spill] sm:$0xff] }
 0x1cf   : > { %v871_v8 = vadd.f32 %v869_v13, %v841_v37  ;;  %v872_v6 = vadd.f32 %v870_v54, %v842_v48  ;;  %v636_v14 = vpop.permute.xlu1 %635  ;;  %v717_v42 = vmul.f32 %v1889_v41, %v706_v18  ;;  %v718_v37 = vmul.f32 %v1889_v41, %v710_v45  ;;  %v2277_v13 = vld [vmem:[#allocation19_spill] sm:$0xff] }
 0x1d0   : > { %v638_v17 = vsel %vm637_vm11, %v1913_v55, %v636_v14  ;;  %v639_v56 = vsel %vm637_vm11, %v636_v14, %v1913_v55  ;;  %v1322_v55 = vld [vmem:[%s2219_s5 + $0x21] ss:$8 sm:$0x3]  ;;  %v927_v41 = vmul.f32 %v2274_v0, %v916_v52  ;;  %v938_v57 = vsel %vm937_vm15, %v2276_v59, %v936_v32 }
 0x1d1   : > { %v659_v27 = vmul.f32 %v657_v12, %v638_v17  ;;  %v660_v2 = vmul.f32 %v658_v50, %v639_v56  ;;  %v946_v44 = vrot.slane %v1322_v55, %v1923_v62  ;;  %v950_v15 = vrot.slane %v1322_v55, %v1925_v63  ;;  %v2278_v56 = vld [vmem:[#allocation15_spill] sm:$0xff]  ;;  %v384_v0 = vld [vmem:[%s2222_s8 + $0x8] sm:$0xff] }
 0x1d2   : > { %v719_v60 = vmul.f32 %v717_v42, %v698_v49  ;;  %v720_v35 = vmul.f32 %v718_v37, %v699_v51  ;;  %v939_v1 = vsel %vm937_vm15, %v936_v32, %v2276_v59  ;;  %v985_v45 = vpop.permute.xlu0 %984  ;;  %v2281_v42 = vmov 0.0   ;;  %v381_v51 = vld [vmem:[%s2220_s6] sm:$0x3] }
 0x1d3   : > { %v661_v7 = vadd.f32 %v659_v27, %v631_v16  ;;  %v662_v21 = vadd.f32 %v660_v2, %v632_v22  ;;  %v876_v23 = vpop.permute.xlu1 %875  ;;  %v957_v28 = vmul.f32 %v2275_v5, %v946_v44  ;;  %v958_v33 = vmul.f32 %v2275_v5, %v950_v15  ;;  %v2279_v2 = vld [vmem:[#allocation17_spill] sm:$0xff]  ;;  %1346 = vmatprep.mubr.msk.f32.mxu1 %vm1592_vm6, %v2281_v42 }
 0x1d4   : > { %v878_v24 = vsel %vm877_vm12, %v1917_v58, %v876_v23  ;;  %v879_v25 = vsel %vm877_vm12, %v876_v23, %v1917_v58  ;;  %v1591_v15 = vmov 0.0|0.0  }
 0x1d5   : > { %v899_v26 = vmul.f32 %v897_v39, %v878_v24  ;;  %v900_v34 = vmul.f32 %v898_v38, %v879_v25  ;;  %v959_v50 = vmul.f32 %v957_v28, %v938_v57  ;;  %1358 = vmatprep.subr.bf16.mxu1 %v1591_v15 }
 0x1d7   : > { %v901_v48 = vadd.f32 %v899_v26, %v871_v8  ;;  %v902_v58 = vadd.f32 %v900_v34, %v872_v6  ;;  %v666_v19 = vpop.permute.xlu1 %665  ;;  %v960_v8 = vmul.f32 %v958_v33, %v939_v1 }
 0x1d8   : > { %v668_v20 = vsel %vm667_vm14, %v1921_v61, %v666_v19  ;;  %v669_v9 = vsel %vm667_vm14, %v666_v19, %v1921_v61 }
 0x1d9   : > { %v689_v62 = vmul.f32 %v687_v36, %v668_v20  ;;  %v690_v63 = vmul.f32 %v688_v43, %v669_v9  ;;  %v383_v20 = vld [vmem:[%s2222_s8] sm:$0xff] }
 0x1da   : > { %1351 = vmatprep.mubr.msk.f32.mxu0 %vm1091_vm7, %v383_v20  ;;  %v382_v9 = vld [vmem:[%s2221_s7] sm:$0x3] }
 0x1db   : > { %v691_v16 = vadd.f32 %v689_v62, %v661_v7  ;;  %v692_v22 = vadd.f32 %v690_v63, %v662_v21  ;;  %v906_v61 = vpop.permute.xlu1 %905 }
 0x1dc   : > { %v908_v54 = vsel %vm907_vm1, %v2277_v13, %v906_v61  ;;  %v909_v10 = vsel %vm907_vm1, %v906_v61, %v2277_v13 }
 0x1dd   : > { %v721_v29 = vadd.f32 %v719_v60, %v691_v16  ;;  %v722_v11 = vadd.f32 %v720_v35, %v692_v22  ;;  %v929_v31 = vmul.f32 %v927_v41, %v908_v54  ;;  %v930_v12 = vmul.f32 %v928_v3, %v909_v10  ;;  %v386_v41 = vld [vmem:[%s2223_s9 + $0x8] sm:$0xff]  ;;  %v385_v3 = vld [vmem:[%s2223_s9] sm:$0xff] }
 0x1df   : > { %v931_v6 = vadd.f32 %v929_v31, %v901_v48  ;;  %v932_v14 = vadd.f32 %v930_v12, %v902_v58  ;;  %v968_v47 = vmul.f32 %v2278_v56, %v721_v29  ;;  %v969_v27 = vmul.f32 %v2278_v56, %v722_v11  ;;  %v2286_v56 = vld [vmem:[#allocation9_spill] sm:$0xff] }
 0x1e1   : > { %v961_v53 = vadd.f32 %v959_v50, %v931_v6  ;;  %v962_v17 = vadd.f32 %v960_v8, %v932_v14  ;;  %v974_v39 = vadd.f32 %v2279_v2, %v968_v47  ;;  %v975_v38 = vadd.f32 %v2279_v2, %v969_v27  ;;  %v2283_v50 = vld [vmem:[#allocation12_spill] sm:$0xff]  ;;  %v2284_v6 = vld [vmem:[#allocation10_spill] sm:$0xff] }
 0x1e3   : > { %v981_v46 = vmul.f32 %v2280_v40, %v961_v53  ;;  %v982_v55 = vmul.f32 %v2280_v40, %v962_v17  ;;  %vm989_vm2 = vcmp.gt.f32.partialorder %v974_v39, 0.0  ;;  %vm990_vm3 = vcmp.gt.f32.partialorder %v975_v38, 0.0  ;;  %v2285_v53 = vld [vmem:[#allocation11_spill] sm:$0xff] }
 0x1e5   : > { %v987_v21 = vadd.f32 %v985_v45, %v981_v46  ;;  %v988_v23 = vadd.f32 %v985_v45, %v982_v55 }
 0x1e7   : > { %vm999_vm4 = vcmp.gt.f32.partialorder %v987_v21, 0.0  ;;  %vm1000_vm5 = vcmp.gt.f32.partialorder %v988_v23, 0.0 }
 0x1ec   : > { %v993_v18 = vpop.permute.xlu1 %992 }
 0x1ed   : > { %v995_v4 = vmul.f32 %v993_v18, %v974_v39  ;;  %v996_v7 = vmul.f32 %v993_v18, %v975_v38 }
 0x1ef   : > { %v2129_v52 = vsel %vm989_vm2, %v974_v39, %v995_v4  ;;  %v2131_v30 = vsel %vm990_vm3, %v975_v38, %v996_v7 }
 0x1f0   : > { %v1003_v24 = vpop.permute.xlu1 %1002  ;;  %v1009_v25 = vadd.f32 %v2131_v30, %v2129_v52 }
 0x1f1   : > { %v1005_v26 = vmul.f32 %v1003_v24, %v987_v21  ;;  %v1006_v34 = vmul.f32 %v1003_v24, %v988_v23 }
 0x1f2   : > { %1010 = vadd.xlane.f32.xlu0 %v1009_v25 }
 0x1f3   : > { %v1007_v36 = vsel %vm999_vm4, %v987_v21, %v1005_v26  ;;  %v1008_v43 = vsel %vm1000_vm5, %v988_v23, %v1006_v34 }
 0x1f4   : > { %v1014_v44 = vadd.f32 %v1008_v43, %v1007_v36 }
 0x1f6   : > { %1015 = vadd.xlane.f32.xlu1 %v1014_v44 }
 0x27f   : > { %v1011_v37 = vpop.xlane.xlu0 %1010 }
 0x280   : > { %v1013_v58 = vmul.f32 0.00390625, %v1011_v37 }
 0x283   : > { %v1016_v48 = vpop.xlane.xlu1 %1015 }
 0x284   : > { %v1017_v19 = vmul.f32 0.00390625, %v1016_v48 }
 0x286   : > { %v1359_v49 = vpack.c.bf16 %v1017_v19, %v1013_v58 }
 0x288   : > { %1360 = vmatpush3.bf16.msra.mxu1 %v1359_v49 }
 0x28b   : > { %1347 = vmatmul.mubr.msk.f32.vlgmr.msra.gmra.mrb[0].mxu1 %vm393_vm0, %v381_v51 }
 0x35e   : > { %v1087_v32 = vpop.f32.mrb[0].mxu1 }
 0x35f   : > { %v1088_v62 = vadd.f32 %v1087_v32, %v382_v9  ;;  %v1348_v63 = vpop.f32.mrb[1].mxu1 }
 0x361   : > { %1349 = vmatprep.subr.msk.mxu0 %vm1098_vm8, %v1088_v62 }
 0x362   : > { %1350 = vmatpush3.msk.msra.mxu0 %vm1098_vm8, %v1088_v62 }
 0x363   : > { %1352 = vmatmul.mubr.msk.f32.vlgmr.msra.gmra.mrb[2].mxu0 %vm1091_vm7, %v384_v0 }
 0x436   : > { %v1353_v5 = vpop.f32.mrb[2].mxu0 }
 0x437   : > { %v1174_v28 = vadd.f32 %v1353_v5, %v386_v41  ;;  %v1168_v33 = vpop.f32.mrb[3].mxu0 }
 0x438   : > { %v1169_v60 = vadd.f32 %v1168_v33, %v385_v3 }
 0x439   : > { %v1328_v35 = vmul.f32 -1.442695, %v1174_v28 }
 0x43a   : > { %v1327_v16 = vmul.f32 -1.442695, %v1169_v60 }
 0x43b   : > { %1456 = vpow2.f32 %v1328_v35 }
 0x43c   : > { %1458 = vpow2.f32 %v1327_v16 }
 0x445   : > { %v1457_v22 = vpop.eup %1456 }
 0x446   : > { %v1459_v61 = vpop.eup %1458  ;;  %v1184_v59 = vadd.f32 1.0, %v1457_v22 }
 0x447   : > { %v1183_v57 = vadd.f32 1.0, %v1459_v61 }
 0x448   : > { %1460 = vrcp.f32 %v1184_v59 }
 0x449   : > { %1462 = vrcp.f32 %v1183_v57 }
 0x452   : > { %v1461_v1 = vpop.eup %1460 }
 0x453   : > { %v1463_v13 = vpop.eup %1462  ;;  %1198 = vperm.xlu1 %1455, %v1461_v1  }
 0x454   : > { %1191 = vperm.xlu0 %1454, %v1463_v13  }
 0x4d2   : > { %v1199_v54 = vpop.permute.xlu1 %1198 }
 0x4d3   : > { %v1201_v10 = vmul.f32 %v1199_v54, %v1007_v36  ;;  %v1202_v29 = vmul.f32 %v1199_v54, %v1008_v43  ;;  %v1192_v11 = vpop.permute.xlu0 %1191 }
 0x4d4   : > { %v1194_v31 = vmul.f32 %v1192_v11, %v2129_v52  ;;  %v1195_v12 = vmul.f32 %v1192_v11, %v2131_v30 }
 0x4d5   : > { %v1205_v8 = vadd.f32 %v1201_v10, %v2283_v50  ;;  %v1206_v14 = vadd.f32 %v1202_v29, %v2284_v6 }
 0x4d6   : > { %v1203_v17 = vadd.f32 %v1194_v31, %v2285_v53  ;;  %v1204_v47 = vadd.f32 %v1195_v12, %v2286_v56 }
 0x4d7   : > { %1209 = vst [vmem:[%s377_s24 + $0x10] sm:$0xff] %v1205_v8  ;;  %1210 = vst [vmem:[%s377_s24 + $0x18] sm:$0xff] %v1206_v14 }
 0x4d8   : > { %1207 = vst [vmem:[%s377_s24] sm:$0xff] %v1203_v17  ;;  %1208 = vst [vmem:[%s377_s24 + $0x8] sm:$0xff] %v1204_v47 }
 0x4d9   : > { %1507 = shalt.err (!%p1504_p2)
}
 0x4da   : > { %s1508_s28 = scalar_lea.hbm %s2169_s22, 512  ;;  %s1512_s1 = scalar_lea.hbm %s2224_s10, 1024 }
 0x4db   : > { %p1509_p4 = scmp.ne.s32.totalorder %s2169_s22, %s1508_s28  ;;  %p1513_p9 = scmp.lt.u32.totalorder %s2169_s22, %s2224_s10 }
 0x4dc   : > { %p1514_p1 = scmp.lt.u32.totalorder %s1512_s1, %s1508_s28  ;;  %p1516_p6 = scmp.lt.u32.totalorder %s1508_s28, %s2169_s22 }
 0x4dd   : > { %p1510_p5 = pnand %p1509_p4, %p2287_p11 }
 0x4de   : > { %p1515_p3 = por %p1514_p1, %p1513_p9 }
 0x4df   : > { %p1511_p7 = pneg %p1510_p5 }
 0x4e0   : > { %p1517_p12 = por %p1516_p6, %p1515_p3 }
 0x4e2   : > { %p1518_p13 = pnand %p1517_p12, %p1511_p7 }
 0x4e4   : > { %1521 = shalt.err (!%p1518_p13)
}
 0x4e5   : > { %s1594_s21 = smov 256  }
 0x4e6   : > { %1363 = dma.vmem_to_hbm [thread:$0]  (%p2287_p11), %s2160_s0, 512, %s2169_s22, %s1212_s20, %s1594_s21, %s1594_s21, %s1577_s12  }
 0x4e7 PF: > { %s1240_s11 = sand.u32 1, %s1548_s13   ;;  %p2288_p8 = scmp.ne.s32.totalorder %s2251_s26, 0 }
 0x4e8   : > { %p2289_p10 = scmp.ge.s32.totalorder %s1560_s16, 2  ;;  %s1241_s30 = scalar_lea.sflag [#allocation4], %s1240_s11 }
 0x4ea   : > { %p1370_p0 = pnand %p2289_p10, %p2288_p8 }
 0x4ec   : > { %1543 = dma.done.wait (!%p1370_p0), %s1241_s30, 512  }
 0x4ed   : > { %1545 = vsyncadd (!%p1370_p0), %s1241_s30, 4294966784  ;;  %s2290_s25 = sld [smem:[#allocation8_spill]]  ;;  %p23_p2 = scmp.ge.s32.totalorder %s1675_s19, 4  }
 0x4ee   : > { %s2291_s13 = smov %s1552_s14  ;;  %s2292_s14 = smov %s1556_s15 }
 0x4ef   : > { %s2294_s16 = smov %s1675_s19  ;;  %25 = sbr.rel (!%p23_p2) target bundleno = 8 (0x8), region = 120 }
 0x4f3   : > { %s2293_s15 = smov %s2290_s25 }
 0x4f6   :  { %1246 = vsyncpa [#allocation3], 1 }
 0x4f7   :  { %1248 = vsyncpa [#allocation3 + $0x1], 1 }
 0x4f8   :  { %1249 = vsyncpa [#allocation4], 1 }
 0x4f9   :  { %1251 = vsyncpa [#allocation4 + $0x1], 1 }

</bundles_post_ra>
